<compile_context>
chip_gen: v6e
topology: v6e:2x2x1
jax: 0.10.0
libtpu: 0.0.40
codegen_flags: <defaults>
</compile_context>

<pallas_src>
import functools

import jax
import jax.numpy as jnp
from jax.experimental import pallas as pl
from jax.experimental.pallas import tpu as pltpu


def _subconv_kernel(w_ref, gamma_ref, beta_ref, x_ref, o_ref, *,
                    cin, ksize, dilation, eps):
    """Fused Conv1d (bias cancelled) + training-mode BatchNorm1d.

    w_ref     : SMEM (C_out, C_in*K) f32    conv weight, row co, col ci*K + k
    gamma_ref : SMEM (C_out,)        f32    BN affine weight
    beta_ref  : SMEM (C_out,)        f32    BN affine bias
    x_ref     : VMEM (C_in, B, T_pad) f32   zero-padded input, time on lanes
    o_ref     : VMEM (B, C_out*T_out) f32   lane-dense output block
    """
    cout = w_ref.shape[0]
    B = x_ref.shape[1]
    t_out = o_ref.shape[1] // cout
    inv_n = 1.0 / float(B * t_out)

    # Load each of the C_in*K tap windows exactly once, directly from the ref
    # (windowed vld; no whole-array load + value slice, no sublane broadcast).
    taps = []
    for ci in range(cin):
        for kk in range(ksize):
            s = kk * dilation                        # static python int
            taps.append(x_ref[ci, :, s:s + t_out])   # (B, T_out) f32

    # Per output channel: C_in*K scalar-splat FMAs on the VPU, single-pass BN
    # statistics, then a store into that channel's segment of the dense
    # (B, C_out*T_out) output block (HBM writeback is one dense DMA).
    for co in range(cout):
        acc = w_ref[co, 0] * taps[0]
        for idx in range(1, cin * ksize):
            acc = acc + w_ref[co, idx] * taps[idx]               # (B, T_out)
        # NOTE: the Conv1d bias is intentionally omitted -- training-mode BN
        # subtracts the per-channel batch mean, which cancels it exactly.

        # Training-mode batch statistics over (B, T_out), single pass
        # (sum + sum-of-squares; no `diff` tensor is materialized).
        s1 = jnp.sum(jnp.sum(acc, axis=1, keepdims=True),
                     axis=0, keepdims=True)                      # (1, 1)
        s2 = jnp.sum(jnp.sum(acc * acc, axis=1, keepdims=True),
                     axis=0, keepdims=True)                      # (1, 1)
        mean = s1 * inv_n
        var = s2 * inv_n - mean * mean                           # biased var
        scale = jax.lax.rsqrt(var + eps) * gamma_ref[co]         # (1, 1), EUP
        shift = beta_ref[co] - mean * scale                      # (1, 1)
        o_ref[:, co * t_out:(co + 1) * t_out] = (
            acc * scale + shift).astype(o_ref.dtype)


def subconv_forward(x, weight, bias, gamma, beta, *, padding, dilation):
    """x: (B, C_in, T) f32.  weight: (C_out, C_in, K).  Returns (B, C_in, r*T_out)."""
    B, C_in, T = x.shape
    C_out, _, K = weight.shape
    T_out = T + 2 * padding - dilation * (K - 1)
    T_pad = T + 2 * padding

    # Conv bias is a no-op under training-mode BN (mean-centering cancels it).
    # TODO(synk): eval-mode BatchNorm (running_mean/var + running-stat updates)
    # is not implemented; if added, the conv bias must be reinstated.
    del bias

    # Host-side prep (one tiny fused XLA op): lay the input out as
    # (C_in, B, T_pad) so every kernel tap is a plain leading-index window
    # load, and zero-pad the time axis for the conv boundary.
    # TODO(synk): at production sizes fold the zero padding into the kernel
    # (masked edge taps / pl.when-gated edge tiles) to save one HBM pass over x.
    x_cbt = jnp.transpose(x, (1, 0, 2)).astype(jnp.float32)
    if padding:
        x_cbt = jnp.pad(x_cbt, ((0, 0), (0, 0), (padding, padding)))

    # Parameters as SMEM scalars: weight row co, column ci*K + k.
    w2 = weight.reshape(C_out, C_in * K).astype(jnp.float32)

    kernel = functools.partial(_subconv_kernel, cin=C_in, ksize=K,
                               dilation=dilation, eps=1e-5)

    # Single block: everything fits easily in VMEM at these shapes.  Block
    # shapes equal the full array dims (so the (8,128) rule is satisfied) and
    # the output block's last dim is C_out*T_out (= 128 here): lane-dense.
    # TODO(synk): at production sizes add a grid over (B, time) with >=512-lane
    # time tiles, halo'd input index_map, two-pass BN (per-tile partial
    # sum/sum-sq + finalize), dimension_semantics=("parallel", ...) so v7x's
    # two TensorCores are used, and vmem_limit_bytes budgeting (64 MiB
    # physical on v7x, 16 MiB scoped default on v5e).
    y2 = pl.pallas_call(
        kernel,
        out_shape=jax.ShapeDtypeStruct((B, C_out * T_out), jnp.float32),
        in_specs=[
            pl.BlockSpec(memory_space=pltpu.MemorySpace.SMEM),   # conv weight
            pl.BlockSpec(memory_space=pltpu.MemorySpace.SMEM),   # gamma
            pl.BlockSpec(memory_space=pltpu.MemorySpace.SMEM),   # beta
            pl.BlockSpec((C_in, B, T_pad), lambda: (0, 0, 0)),   # input, VMEM
        ],
        out_specs=pl.BlockSpec((B, C_out * T_out), lambda: (0, 0)),
    )(w2, gamma.astype(jnp.float32), beta.astype(jnp.float32), x_cbt)

    # torch.reshape(x, (B, C, -1)): (B, C_out*T_out) is already the contiguous
    # row-major layout of (B, C_out, T_out), so this reshape is free.
    return y2.reshape(B, C_in, -1)


def _reference(x, weight, bias, gamma, beta, *, padding, dilation):
    """Pure-JAX reference of the PyTorch module (training-mode BN)."""
    B, C_in, T = x.shape
    C_out, _, K = weight.shape
    T_out = T + 2 * padding - dilation * (K - 1)
    xp = jnp.pad(x, ((0, 0), (0, 0), (padding, padding)))
    taps = jnp.stack(
        [xp[:, :, k * dilation:k * dilation + T_out] for k in range(K)], axis=2
    )                                                    # (B, C_in, K, T_out)
    y = jnp.einsum("bckt,ock->bot", taps, weight) + bias[None, :, None]
    mean = y.mean(axis=(0, 2), keepdims=True)
    var = ((y - mean) ** 2).mean(axis=(0, 2), keepdims=True)
    y = (y - mean) * jax.lax.rsqrt(var + 1e-5) * gamma[None, :, None] + beta[None, :, None]
    return y.reshape(B, C_in, -1)


if __name__ == "__main__":
    # Module config: SubConv(in_channels=4, r=2, kernel_sizes=3, paddings=1, dilations=1)
    in_channels, r = 4, 2
    kernel_size, padding, dilation = 3, 1, 1
    B, T = 2, 16
    C_out = in_channels * r

    key = jax.random.PRNGKey(0)
    kx, kw, kb, kg, kbe = jax.random.split(key, 5)

    bound = 1.0 / (in_channels * kernel_size) ** 0.5
    weight = jax.random.uniform(kw, (C_out, in_channels, kernel_size),
                                jnp.float32, -bound, bound)
    bias = jax.random.uniform(kb, (C_out,), jnp.float32, -bound, bound)
    gamma = jax.random.uniform(kg, (C_out,), jnp.float32, 0.5, 1.5)
    beta = jax.random.uniform(kbe, (C_out,), jnp.float32, -0.5, 0.5)

    x = jax.random.uniform(kx, (B, in_channels, T), jnp.float32)

    y = subconv_forward(x, weight, bias, gamma, beta,
                        padding=padding, dilation=dilation)
    jax.block_until_ready(y)
    assert y.shape == (B, in_channels, r * T), y.shape

    y_ref = _reference(x, weight, bias, gamma, beta,
                       padding=padding, dilation=dilation)
    assert jnp.allclose(y, y_ref, atol=1e-3, rtol=1e-3), float(
        jnp.max(jnp.abs(y - y_ref)))

    print("KERNEL_OK")
</pallas_src>

<mosaic_0001>
module attributes {stable_mosaic.version = 11 : i64} {
  func.func @_subconv_kernel(%arg0: memref<8x12xf32, #tpu.memory_space<smem>>, %arg1: memref<8xf32, #tpu.memory_space<smem>>, %arg2: memref<8xf32, #tpu.memory_space<smem>>, %arg3: memref<4x2x18xf32, #tpu.memory_space<vmem>>, %arg4: memref<2x128xf32, #tpu.memory_space<vmem>>) attributes {dimension_semantics = [], scalar_prefetch = 0 : i64, scratch_operands = 0 : i64, tpu.core_type = #tpu.core_type<tc>} {
    %c0 = arith.constant 0 : index
    %c0_0 = arith.constant 0 : index
    %c0_1 = arith.constant 0 : index
    %0 = vector.load %arg3[%c0, %c0_0, %c0_1] : memref<4x2x18xf32, #tpu.memory_space<vmem>>, vector<1x2x16xf32>
    %1 = vector.shape_cast %0 : vector<1x2x16xf32> to vector<2x16xf32>
    %c0_2 = arith.constant 0 : index
    %c0_3 = arith.constant 0 : index
    %c1 = arith.constant 1 : index
    %2 = vector.load %arg3[%c0_2, %c0_3, %c1] : memref<4x2x18xf32, #tpu.memory_space<vmem>>, vector<1x2x16xf32>
    %3 = vector.shape_cast %2 : vector<1x2x16xf32> to vector<2x16xf32>
    %c0_4 = arith.constant 0 : index
    %c0_5 = arith.constant 0 : index
    %c2 = arith.constant 2 : index
    %4 = vector.load %arg3[%c0_4, %c0_5, %c2] : memref<4x2x18xf32, #tpu.memory_space<vmem>>, vector<1x2x16xf32>
    %5 = vector.shape_cast %4 : vector<1x2x16xf32> to vector<2x16xf32>
    %c1_6 = arith.constant 1 : index
    %c0_7 = arith.constant 0 : index
    %c0_8 = arith.constant 0 : index
    %6 = vector.load %arg3[%c1_6, %c0_7, %c0_8] : memref<4x2x18xf32, #tpu.memory_space<vmem>>, vector<1x2x16xf32>
    %7 = vector.shape_cast %6 : vector<1x2x16xf32> to vector<2x16xf32>
    %c1_9 = arith.constant 1 : index
    %c0_10 = arith.constant 0 : index
    %c1_11 = arith.constant 1 : index
    %8 = vector.load %arg3[%c1_9, %c0_10, %c1_11] : memref<4x2x18xf32, #tpu.memory_space<vmem>>, vector<1x2x16xf32>
    %9 = vector.shape_cast %8 : vector<1x2x16xf32> to vector<2x16xf32>
    %c1_12 = arith.constant 1 : index
    %c0_13 = arith.constant 0 : index
    %c2_14 = arith.constant 2 : index
    %10 = vector.load %arg3[%c1_12, %c0_13, %c2_14] : memref<4x2x18xf32, #tpu.memory_space<vmem>>, vector<1x2x16xf32>
    %11 = vector.shape_cast %10 : vector<1x2x16xf32> to vector<2x16xf32>
    %c2_15 = arith.constant 2 : index
    %c0_16 = arith.constant 0 : index
    %c0_17 = arith.constant 0 : index
    %12 = vector.load %arg3[%c2_15, %c0_16, %c0_17] : memref<4x2x18xf32, #tpu.memory_space<vmem>>, vector<1x2x16xf32>
    %13 = vector.shape_cast %12 : vector<1x2x16xf32> to vector<2x16xf32>
    %c2_18 = arith.constant 2 : index
    %c0_19 = arith.constant 0 : index
    %c1_20 = arith.constant 1 : index
    %14 = vector.load %arg3[%c2_18, %c0_19, %c1_20] : memref<4x2x18xf32, #tpu.memory_space<vmem>>, vector<1x2x16xf32>
    %15 = vector.shape_cast %14 : vector<1x2x16xf32> to vector<2x16xf32>
    %c2_21 = arith.constant 2 : index
    %c0_22 = arith.constant 0 : index
    %c2_23 = arith.constant 2 : index
    %16 = vector.load %arg3[%c2_21, %c0_22, %c2_23] : memref<4x2x18xf32, #tpu.memory_space<vmem>>, vector<1x2x16xf32>
    %17 = vector.shape_cast %16 : vector<1x2x16xf32> to vector<2x16xf32>
    %c3 = arith.constant 3 : index
    %c0_24 = arith.constant 0 : index
    %c0_25 = arith.constant 0 : index
    %18 = vector.load %arg3[%c3, %c0_24, %c0_25] : memref<4x2x18xf32, #tpu.memory_space<vmem>>, vector<1x2x16xf32>
    %19 = vector.shape_cast %18 : vector<1x2x16xf32> to vector<2x16xf32>
    %c3_26 = arith.constant 3 : index
    %c0_27 = arith.constant 0 : index
    %c1_28 = arith.constant 1 : index
    %20 = vector.load %arg3[%c3_26, %c0_27, %c1_28] : memref<4x2x18xf32, #tpu.memory_space<vmem>>, vector<1x2x16xf32>
    %21 = vector.shape_cast %20 : vector<1x2x16xf32> to vector<2x16xf32>
    %c3_29 = arith.constant 3 : index
    %c0_30 = arith.constant 0 : index
    %c2_31 = arith.constant 2 : index
    %22 = vector.load %arg3[%c3_29, %c0_30, %c2_31] : memref<4x2x18xf32, #tpu.memory_space<vmem>>, vector<1x2x16xf32>
    %23 = vector.shape_cast %22 : vector<1x2x16xf32> to vector<2x16xf32>
    %c0_32 = arith.constant 0 : index
    %c0_33 = arith.constant 0 : index
    %24 = memref.load %arg0[%c0_32, %c0_33] : memref<8x12xf32, #tpu.memory_space<smem>>
    %25 = vector.broadcast %24 : f32 to vector<2x16xf32>
    %26 = arith.mulf %25, %1 : vector<2x16xf32>
    %c0_34 = arith.constant 0 : index
    %c1_35 = arith.constant 1 : index
    %27 = memref.load %arg0[%c0_34, %c1_35] : memref<8x12xf32, #tpu.memory_space<smem>>
    %28 = vector.broadcast %27 : f32 to vector<2x16xf32>
    %29 = arith.mulf %28, %3 : vector<2x16xf32>
    %30 = arith.addf %26, %29 : vector<2x16xf32>
    %c0_36 = arith.constant 0 : index
    %c2_37 = arith.constant 2 : index
    %31 = memref.load %arg0[%c0_36, %c2_37] : memref<8x12xf32, #tpu.memory_space<smem>>
    %32 = vector.broadcast %31 : f32 to vector<2x16xf32>
    %33 = arith.mulf %32, %5 : vector<2x16xf32>
    %34 = arith.addf %30, %33 : vector<2x16xf32>
    %c0_38 = arith.constant 0 : index
    %c3_39 = arith.constant 3 : index
    %35 = memref.load %arg0[%c0_38, %c3_39] : memref<8x12xf32, #tpu.memory_space<smem>>
    %36 = vector.broadcast %35 : f32 to vector<2x16xf32>
    %37 = arith.mulf %36, %7 : vector<2x16xf32>
    %38 = arith.addf %34, %37 : vector<2x16xf32>
    %c0_40 = arith.constant 0 : index
    %c4 = arith.constant 4 : index
    %39 = memref.load %arg0[%c0_40, %c4] : memref<8x12xf32, #tpu.memory_space<smem>>
    %40 = vector.broadcast %39 : f32 to vector<2x16xf32>
    %41 = arith.mulf %40, %9 : vector<2x16xf32>
    %42 = arith.addf %38, %41 : vector<2x16xf32>
    %c0_41 = arith.constant 0 : index
    %c5 = arith.constant 5 : index
    %43 = memref.load %arg0[%c0_41, %c5] : memref<8x12xf32, #tpu.memory_space<smem>>
    %44 = vector.broadcast %43 : f32 to vector<2x16xf32>
    %45 = arith.mulf %44, %11 : vector<2x16xf32>
    %46 = arith.addf %42, %45 : vector<2x16xf32>
    %c0_42 = arith.constant 0 : index
    %c6 = arith.constant 6 : index
    %47 = memref.load %arg0[%c0_42, %c6] : memref<8x12xf32, #tpu.memory_space<smem>>
    %48 = vector.broadcast %47 : f32 to vector<2x16xf32>
    %49 = arith.mulf %48, %13 : vector<2x16xf32>
    %50 = arith.addf %46, %49 : vector<2x16xf32>
    %c0_43 = arith.constant 0 : index
    %c7 = arith.constant 7 : index
    %51 = memref.load %arg0[%c0_43, %c7] : memref<8x12xf32, #tpu.memory_space<smem>>
    %52 = vector.broadcast %51 : f32 to vector<2x16xf32>
    %53 = arith.mulf %52, %15 : vector<2x16xf32>
    %54 = arith.addf %50, %53 : vector<2x16xf32>
    %c0_44 = arith.constant 0 : index
    %c8 = arith.constant 8 : index
    %55 = memref.load %arg0[%c0_44, %c8] : memref<8x12xf32, #tpu.memory_space<smem>>
    %56 = vector.broadcast %55 : f32 to vector<2x16xf32>
    %57 = arith.mulf %56, %17 : vector<2x16xf32>
    %58 = arith.addf %54, %57 : vector<2x16xf32>
    %c0_45 = arith.constant 0 : index
    %c9 = arith.constant 9 : index
    %59 = memref.load %arg0[%c0_45, %c9] : memref<8x12xf32, #tpu.memory_space<smem>>
    %60 = vector.broadcast %59 : f32 to vector<2x16xf32>
    %61 = arith.mulf %60, %19 : vector<2x16xf32>
    %62 = arith.addf %58, %61 : vector<2x16xf32>
    %c0_46 = arith.constant 0 : index
    %c10 = arith.constant 10 : index
    %63 = memref.load %arg0[%c0_46, %c10] : memref<8x12xf32, #tpu.memory_space<smem>>
    %64 = vector.broadcast %63 : f32 to vector<2x16xf32>
    %65 = arith.mulf %64, %21 : vector<2x16xf32>
    %66 = arith.addf %62, %65 : vector<2x16xf32>
    %c0_47 = arith.constant 0 : index
    %c11 = arith.constant 11 : index
    %67 = memref.load %arg0[%c0_47, %c11] : memref<8x12xf32, #tpu.memory_space<smem>>
    %68 = vector.broadcast %67 : f32 to vector<2x16xf32>
    %69 = arith.mulf %68, %23 : vector<2x16xf32>
    %70 = arith.addf %66, %69 : vector<2x16xf32>
    %cst = arith.constant dense<0.000000e+00> : vector<2xf32>
    %71 = vector.multi_reduction <add>, %70, %cst [1] : vector<2x16xf32> to vector<2xf32>
    %72 = vector.shape_cast %71 : vector<2xf32> to vector<2x1xf32>
    %cst_48 = arith.constant dense<0.000000e+00> : vector<1xf32>
    %73 = vector.multi_reduction <add>, %72, %cst_48 [0] : vector<2x1xf32> to vector<1xf32>
    %74 = vector.shape_cast %73 : vector<1xf32> to vector<1x1xf32>
    %75 = arith.mulf %70, %70 : vector<2x16xf32>
    %cst_49 = arith.constant dense<0.000000e+00> : vector<2xf32>
    %76 = vector.multi_reduction <add>, %75, %cst_49 [1] : vector<2x16xf32> to vector<2xf32>
    %77 = vector.shape_cast %76 : vector<2xf32> to vector<2x1xf32>
    %cst_50 = arith.constant dense<0.000000e+00> : vector<1xf32>
    %78 = vector.multi_reduction <add>, %77, %cst_50 [0] : vector<2x1xf32> to vector<1xf32>
    %79 = vector.shape_cast %78 : vector<1xf32> to vector<1x1xf32>
    %cst_51 = arith.constant 3.125000e-02 : f32
    %80 = vector.broadcast %cst_51 : f32 to vector<1x1xf32>
    %81 = arith.mulf %74, %80 : vector<1x1xf32>
    %cst_52 = arith.constant 3.125000e-02 : f32
    %82 = vector.broadcast %cst_52 : f32 to vector<1x1xf32>
    %83 = arith.mulf %79, %82 : vector<1x1xf32>
    %84 = arith.mulf %81, %81 : vector<1x1xf32>
    %85 = arith.subf %83, %84 : vector<1x1xf32>
    %cst_53 = arith.constant 9.99999974E-6 : f32
    %86 = vector.broadcast %cst_53 : f32 to vector<1x1xf32>
    %87 = arith.addf %85, %86 : vector<1x1xf32>
    %88 = math.rsqrt %87 : vector<1x1xf32>
    %c0_54 = arith.constant 0 : index
    %89 = memref.load %arg1[%c0_54] : memref<8xf32, #tpu.memory_space<smem>>
    %90 = vector.broadcast %89 : f32 to vector<1x1xf32>
    %91 = arith.mulf %88, %90 : vector<1x1xf32>
    %c0_55 = arith.constant 0 : index
    %92 = memref.load %arg2[%c0_55] : memref<8xf32, #tpu.memory_space<smem>>
    %93 = arith.mulf %81, %91 : vector<1x1xf32>
    %94 = vector.broadcast %92 : f32 to vector<1x1xf32>
    %95 = arith.subf %94, %93 : vector<1x1xf32>
    %96 = vector.broadcast %91 : vector<1x1xf32> to vector<2x16xf32>
    %97 = arith.mulf %70, %96 : vector<2x16xf32>
    %98 = vector.broadcast %95 : vector<1x1xf32> to vector<2x16xf32>
    %99 = arith.addf %97, %98 : vector<2x16xf32>
    %c0_56 = arith.constant 0 : index
    %c0_57 = arith.constant 0 : index
    %100 = vector.load %arg4[%c0_56, %c0_57] : memref<2x128xf32, #tpu.memory_space<vmem>>, vector<2x16xf32>
    tpu.vector_store %arg4[%c0_56, %c0_57], %99 {strides = array<i32>} : memref<2x128xf32, #tpu.memory_space<vmem>>, vector<2x16xf32>,
    %c1_58 = arith.constant 1 : index
    %c0_59 = arith.constant 0 : index
    %101 = memref.load %arg0[%c1_58, %c0_59] : memref<8x12xf32, #tpu.memory_space<smem>>
    %102 = vector.broadcast %101 : f32 to vector<2x16xf32>
    %103 = arith.mulf %102, %1 : vector<2x16xf32>
    %c1_60 = arith.constant 1 : index
    %c1_61 = arith.constant 1 : index
    %104 = memref.load %arg0[%c1_60, %c1_61] : memref<8x12xf32, #tpu.memory_space<smem>>
    %105 = vector.broadcast %104 : f32 to vector<2x16xf32>
    %106 = arith.mulf %105, %3 : vector<2x16xf32>
    %107 = arith.addf %103, %106 : vector<2x16xf32>
    %c1_62 = arith.constant 1 : index
    %c2_63 = arith.constant 2 : index
    %108 = memref.load %arg0[%c1_62, %c2_63] : memref<8x12xf32, #tpu.memory_space<smem>>
    %109 = vector.broadcast %108 : f32 to vector<2x16xf32>
    %110 = arith.mulf %109, %5 : vector<2x16xf32>
    %111 = arith.addf %107, %110 : vector<2x16xf32>
    %c1_64 = arith.constant 1 : index
    %c3_65 = arith.constant 3 : index
    %112 = memref.load %arg0[%c1_64, %c3_65] : memref<8x12xf32, #tpu.memory_space<smem>>
    %113 = vector.broadcast %112 : f32 to vector<2x16xf32>
    %114 = arith.mulf %113, %7 : vector<2x16xf32>
    %115 = arith.addf %111, %114 : vector<2x16xf32>
    %c1_66 = arith.constant 1 : index
    %c4_67 = arith.constant 4 : index
    %116 = memref.load %arg0[%c1_66, %c4_67] : memref<8x12xf32, #tpu.memory_space<smem>>
    %117 = vector.broadcast %116 : f32 to vector<2x16xf32>
    %118 = arith.mulf %117, %9 : vector<2x16xf32>
    %119 = arith.addf %115, %118 : vector<2x16xf32>
    %c1_68 = arith.constant 1 : index
    %c5_69 = arith.constant 5 : index
    %120 = memref.load %arg0[%c1_68, %c5_69] : memref<8x12xf32, #tpu.memory_space<smem>>
    %121 = vector.broadcast %120 : f32 to vector<2x16xf32>
    %122 = arith.mulf %121, %11 : vector<2x16xf32>
    %123 = arith.addf %119, %122 : vector<2x16xf32>
    %c1_70 = arith.constant 1 : index
    %c6_71 = arith.constant 6 : index
    %124 = memref.load %arg0[%c1_70, %c6_71] : memref<8x12xf32, #tpu.memory_space<smem>>
    %125 = vector.broadcast %124 : f32 to vector<2x16xf32>
    %126 = arith.mulf %125, %13 : vector<2x16xf32>
    %127 = arith.addf %123, %126 : vector<2x16xf32>
    %c1_72 = arith.constant 1 : index
    %c7_73 = arith.constant 7 : index
    %128 = memref.load %arg0[%c1_72, %c7_73] : memref<8x12xf32, #tpu.memory_space<smem>>
    %129 = vector.broadcast %128 : f32 to vector<2x16xf32>
    %130 = arith.mulf %129, %15 : vector<2x16xf32>
    %131 = arith.addf %127, %130 : vector<2x16xf32>
    %c1_74 = arith.constant 1 : index
    %c8_75 = arith.constant 8 : index
    %132 = memref.load %arg0[%c1_74, %c8_75] : memref<8x12xf32, #tpu.memory_space<smem>>
    %133 = vector.broadcast %132 : f32 to vector<2x16xf32>
    %134 = arith.mulf %133, %17 : vector<2x16xf32>
    %135 = arith.addf %131, %134 : vector<2x16xf32>
    %c1_76 = arith.constant 1 : index
    %c9_77 = arith.constant 9 : index
    %136 = memref.load %arg0[%c1_76, %c9_77] : memref<8x12xf32, #tpu.memory_space<smem>>
    %137 = vector.broadcast %136 : f32 to vector<2x16xf32>
    %138 = arith.mulf %137, %19 : vector<2x16xf32>
    %139 = arith.addf %135, %138 : vector<2x16xf32>
    %c1_78 = arith.constant 1 : index
    %c10_79 = arith.constant 10 : index
    %140 = memref.load %arg0[%c1_78, %c10_79] : memref<8x12xf32, #tpu.memory_space<smem>>
    %141 = vector.broadcast %140 : f32 to vector<2x16xf32>
    %142 = arith.mulf %141, %21 : vector<2x16xf32>
    %143 = arith.addf %139, %142 : vector<2x16xf32>
    %c1_80 = arith.constant 1 : index
    %c11_81 = arith.constant 11 : index
    %144 = memref.load %arg0[%c1_80, %c11_81] : memref<8x12xf32, #tpu.memory_space<smem>>
    %145 = vector.broadcast %144 : f32 to vector<2x16xf32>
    %146 = arith.mulf %145, %23 : vector<2x16xf32>
    %147 = arith.addf %143, %146 : vector<2x16xf32>
    %cst_82 = arith.constant dense<0.000000e+00> : vector<2xf32>
    %148 = vector.multi_reduction <add>, %147, %cst_82 [1] : vector<2x16xf32> to vector<2xf32>
    %149 = vector.shape_cast %148 : vector<2xf32> to vector<2x1xf32>
    %cst_83 = arith.constant dense<0.000000e+00> : vector<1xf32>
    %150 = vector.multi_reduction <add>, %149, %cst_83 [0] : vector<2x1xf32> to vector<1xf32>
    %151 = vector.shape_cast %150 : vector<1xf32> to vector<1x1xf32>
    %152 = arith.mulf %147, %147 : vector<2x16xf32>
    %cst_84 = arith.constant dense<0.000000e+00> : vector<2xf32>
    %153 = vector.multi_reduction <add>, %152, %cst_84 [1] : vector<2x16xf32> to vector<2xf32>
    %154 = vector.shape_cast %153 : vector<2xf32> to vector<2x1xf32>
    %cst_85 = arith.constant dense<0.000000e+00> : vector<1xf32>
    %155 = vector.multi_reduction <add>, %154, %cst_85 [0] : vector<2x1xf32> to vector<1xf32>
    %156 = vector.shape_cast %155 : vector<1xf32> to vector<1x1xf32>
    %cst_86 = arith.constant 3.125000e-02 : f32
    %157 = vector.broadcast %cst_86 : f32 to vector<1x1xf32>
    %158 = arith.mulf %151, %157 : vector<1x1xf32>
    %cst_87 = arith.constant 3.125000e-02 : f32
    %159 = vector.broadcast %cst_87 : f32 to vector<1x1xf32>
    %160 = arith.mulf %156, %159 : vector<1x1xf32>
    %161 = arith.mulf %158, %158 : vector<1x1xf32>
    %162 = arith.subf %160, %161 : vector<1x1xf32>
    %cst_88 = arith.constant 9.99999974E-6 : f32
    %163 = vector.broadcast %cst_88 : f32 to vector<1x1xf32>
    %164 = arith.addf %162, %163 : vector<1x1xf32>
    %165 = math.rsqrt %164 : vector<1x1xf32>
    %c1_89 = arith.constant 1 : index
    %166 = memref.load %arg1[%c1_89] : memref<8xf32, #tpu.memory_space<smem>>
    %167 = vector.broadcast %166 : f32 to vector<1x1xf32>
    %168 = arith.mulf %165, %167 : vector<1x1xf32>
    %c1_90 = arith.constant 1 : index
    %169 = memref.load %arg2[%c1_90] : memref<8xf32, #tpu.memory_space<smem>>
    %170 = arith.mulf %158, %168 : vector<1x1xf32>
    %171 = vector.broadcast %169 : f32 to vector<1x1xf32>
    %172 = arith.subf %171, %170 : vector<1x1xf32>
    %173 = vector.broadcast %168 : vector<1x1xf32> to vector<2x16xf32>
    %174 = arith.mulf %147, %173 : vector<2x16xf32>
    %175 = vector.broadcast %172 : vector<1x1xf32> to vector<2x16xf32>
    %176 = arith.addf %174, %175 : vector<2x16xf32>
    %c0_91 = arith.constant 0 : index
    %c16 = arith.constant 16 : index
    %177 = vector.load %arg4[%c0_91, %c16] : memref<2x128xf32, #tpu.memory_space<vmem>>, vector<2x16xf32>
    tpu.vector_store %arg4[%c0_91, %c16], %176 {strides = array<i32>} : memref<2x128xf32, #tpu.memory_space<vmem>>, vector<2x16xf32>,
    %c2_92 = arith.constant 2 : index
    %c0_93 = arith.constant 0 : index
    %178 = memref.load %arg0[%c2_92, %c0_93] : memref<8x12xf32, #tpu.memory_space<smem>>
    %179 = vector.broadcast %178 : f32 to vector<2x16xf32>
    %180 = arith.mulf %179, %1 : vector<2x16xf32>
    %c2_94 = arith.constant 2 : index
    %c1_95 = arith.constant 1 : index
    %181 = memref.load %arg0[%c2_94, %c1_95] : memref<8x12xf32, #tpu.memory_space<smem>>
    %182 = vector.broadcast %181 : f32 to vector<2x16xf32>
    %183 = arith.mulf %182, %3 : vector<2x16xf32>
    %184 = arith.addf %180, %183 : vector<2x16xf32>
    %c2_96 = arith.constant 2 : index
    %c2_97 = arith.constant 2 : index
    %185 = memref.load %arg0[%c2_96, %c2_97] : memref<8x12xf32, #tpu.memory_space<smem>>
    %186 = vector.broadcast %185 : f32 to vector<2x16xf32>
    %187 = arith.mulf %186, %5 : vector<2x16xf32>
    %188 = arith.addf %184, %187 : vector<2x16xf32>
    %c2_98 = arith.constant 2 : index
    %c3_99 = arith.constant 3 : index
    %189 = memref.load %arg0[%c2_98, %c3_99] : memref<8x12xf32, #tpu.memory_space<smem>>
    %190 = vector.broadcast %189 : f32 to vector<2x16xf32>
    %191 = arith.mulf %190, %7 : vector<2x16xf32>
    %192 = arith.addf %188, %191 : vector<2x16xf32>
    %c2_100 = arith.constant 2 : index
    %c4_101 = arith.constant 4 : index
    %193 = memref.load %arg0[%c2_100, %c4_101] : memref<8x12xf32, #tpu.memory_space<smem>>
    %194 = vector.broadcast %193 : f32 to vector<2x16xf32>
    %195 = arith.mulf %194, %9 : vector<2x16xf32>
    %196 = arith.addf %192, %195 : vector<2x16xf32>
    %c2_102 = arith.constant 2 : index
    %c5_103 = arith.constant 5 : index
    %197 = memref.load %arg0[%c2_102, %c5_103] : memref<8x12xf32, #tpu.memory_space<smem>>
    %198 = vector.broadcast %197 : f32 to vector<2x16xf32>
    %199 = arith.mulf %198, %11 : vector<2x16xf32>
    %200 = arith.addf %196, %199 : vector<2x16xf32>
    %c2_104 = arith.constant 2 : index
    %c6_105 = arith.constant 6 : index
    %201 = memref.load %arg0[%c2_104, %c6_105] : memref<8x12xf32, #tpu.memory_space<smem>>
    %202 = vector.broadcast %201 : f32 to vector<2x16xf32>
    %203 = arith.mulf %202, %13 : vector<2x16xf32>
    %204 = arith.addf %200, %203 : vector<2x16xf32>
    %c2_106 = arith.constant 2 : index
    %c7_107 = arith.constant 7 : index
    %205 = memref.load %arg0[%c2_106, %c7_107] : memref<8x12xf32, #tpu.memory_space<smem>>
    %206 = vector.broadcast %205 : f32 to vector<2x16xf32>
    %207 = arith.mulf %206, %15 : vector<2x16xf32>
    %208 = arith.addf %204, %207 : vector<2x16xf32>
    %c2_108 = arith.constant 2 : index
    %c8_109 = arith.constant 8 : index
    %209 = memref.load %arg0[%c2_108, %c8_109] : memref<8x12xf32, #tpu.memory_space<smem>>
    %210 = vector.broadcast %209 : f32 to vector<2x16xf32>
    %211 = arith.mulf %210, %17 : vector<2x16xf32>
    %212 = arith.addf %208, %211 : vector<2x16xf32>
    %c2_110 = arith.constant 2 : index
    %c9_111 = arith.constant 9 : index
    %213 = memref.load %arg0[%c2_110, %c9_111] : memref<8x12xf32, #tpu.memory_space<smem>>
    %214 = vector.broadcast %213 : f32 to vector<2x16xf32>
    %215 = arith.mulf %214, %19 : vector<2x16xf32>
    %216 = arith.addf %212, %215 : vector<2x16xf32>
    %c2_112 = arith.constant 2 : index
    %c10_113 = arith.constant 10 : index
    %217 = memref.load %arg0[%c2_112, %c10_113] : memref<8x12xf32, #tpu.memory_space<smem>>
    %218 = vector.broadcast %217 : f32 to vector<2x16xf32>
    %219 = arith.mulf %218, %21 : vector<2x16xf32>
    %220 = arith.addf %216, %219 : vector<2x16xf32>
    %c2_114 = arith.constant 2 : index
    %c11_115 = arith.constant 11 : index
    %221 = memref.load %arg0[%c2_114, %c11_115] : memref<8x12xf32, #tpu.memory_space<smem>>
    %222 = vector.broadcast %221 : f32 to vector<2x16xf32>
    %223 = arith.mulf %222, %23 : vector<2x16xf32>
    %224 = arith.addf %220, %223 : vector<2x16xf32>
    %cst_116 = arith.constant dense<0.000000e+00> : vector<2xf32>
    %225 = vector.multi_reduction <add>, %224, %cst_116 [1] : vector<2x16xf32> to vector<2xf32>
    %226 = vector.shape_cast %225 : vector<2xf32> to vector<2x1xf32>
    %cst_117 = arith.constant dense<0.000000e+00> : vector<1xf32>
    %227 = vector.multi_reduction <add>, %226, %cst_117 [0] : vector<2x1xf32> to vector<1xf32>
    %228 = vector.shape_cast %227 : vector<1xf32> to vector<1x1xf32>
    %229 = arith.mulf %224, %224 : vector<2x16xf32>
    %cst_118 = arith.constant dense<0.000000e+00> : vector<2xf32>
    %230 = vector.multi_reduction <add>, %229, %cst_118 [1] : vector<2x16xf32> to vector<2xf32>
    %231 = vector.shape_cast %230 : vector<2xf32> to vector<2x1xf32>
    %cst_119 = arith.constant dense<0.000000e+00> : vector<1xf32>
    %232 = vector.multi_reduction <add>, %231, %cst_119 [0] : vector<2x1xf32> to vector<1xf32>
    %233 = vector.shape_cast %232 : vector<1xf32> to vector<1x1xf32>
    %cst_120 = arith.constant 3.125000e-02 : f32
    %234 = vector.broadcast %cst_120 : f32 to vector<1x1xf32>
    %235 = arith.mulf %228, %234 : vector<1x1xf32>
    %cst_121 = arith.constant 3.125000e-02 : f32
    %236 = vector.broadcast %cst_121 : f32 to vector<1x1xf32>
    %237 = arith.mulf %233, %236 : vector<1x1xf32>
    %238 = arith.mulf %235, %235 : vector<1x1xf32>
    %239 = arith.subf %237, %238 : vector<1x1xf32>
    %cst_122 = arith.constant 9.99999974E-6 : f32
    %240 = vector.broadcast %cst_122 : f32 to vector<1x1xf32>
    %241 = arith.addf %239, %240 : vector<1x1xf32>
    %242 = math.rsqrt %241 : vector<1x1xf32>
    %c2_123 = arith.constant 2 : index
    %243 = memref.load %arg1[%c2_123] : memref<8xf32, #tpu.memory_space<smem>>
    %244 = vector.broadcast %243 : f32 to vector<1x1xf32>
    %245 = arith.mulf %242, %244 : vector<1x1xf32>
    %c2_124 = arith.constant 2 : index
    %246 = memref.load %arg2[%c2_124] : memref<8xf32, #tpu.memory_space<smem>>
    %247 = arith.mulf %235, %245 : vector<1x1xf32>
    %248 = vector.broadcast %246 : f32 to vector<1x1xf32>
    %249 = arith.subf %248, %247 : vector<1x1xf32>
    %250 = vector.broadcast %245 : vector<1x1xf32> to vector<2x16xf32>
    %251 = arith.mulf %224, %250 : vector<2x16xf32>
    %252 = vector.broadcast %249 : vector<1x1xf32> to vector<2x16xf32>
    %253 = arith.addf %251, %252 : vector<2x16xf32>
    %c0_125 = arith.constant 0 : index
    %c32 = arith.constant 32 : index
    %254 = vector.load %arg4[%c0_125, %c32] : memref<2x128xf32, #tpu.memory_space<vmem>>, vector<2x16xf32>
    tpu.vector_store %arg4[%c0_125, %c32], %253 {strides = array<i32>} : memref<2x128xf32, #tpu.memory_space<vmem>>, vector<2x16xf32>,
    %c3_126 = arith.constant 3 : index
    %c0_127 = arith.constant 0 : index
    %255 = memref.load %arg0[%c3_126, %c0_127] : memref<8x12xf32, #tpu.memory_space<smem>>
    %256 = vector.broadcast %255 : f32 to vector<2x16xf32>
    %257 = arith.mulf %256, %1 : vector<2x16xf32>
    %c3_128 = arith.constant 3 : index
    %c1_129 = arith.constant 1 : index
    %258 = memref.load %arg0[%c3_128, %c1_129] : memref<8x12xf32, #tpu.memory_space<smem>>
    %259 = vector.broadcast %258 : f32 to vector<2x16xf32>
    %260 = arith.mulf %259, %3 : vector<2x16xf32>
    %261 = arith.addf %257, %260 : vector<2x16xf32>
    %c3_130 = arith.constant 3 : index
    %c2_131 = arith.constant 2 : index
    %262 = memref.load %arg0[%c3_130, %c2_131] : memref<8x12xf32, #tpu.memory_space<smem>>
    %263 = vector.broadcast %262 : f32 to vector<2x16xf32>
    %264 = arith.mulf %263, %5 : vector<2x16xf32>
    %265 = arith.addf %261, %264 : vector<2x16xf32>
    %c3_132 = arith.constant 3 : index
    %c3_133 = arith.constant 3 : index
    %266 = memref.load %arg0[%c3_132, %c3_133] : memref<8x12xf32, #tpu.memory_space<smem>>
    %267 = vector.broadcast %266 : f32 to vector<2x16xf32>
    %268 = arith.mulf %267, %7 : vector<2x16xf32>
    %269 = arith.addf %265, %268 : vector<2x16xf32>
    %c3_134 = arith.constant 3 : index
    %c4_135 = arith.constant 4 : index
    %270 = memref.load %arg0[%c3_134, %c4_135] : memref<8x12xf32, #tpu.memory_space<smem>>
    %271 = vector.broadcast %270 : f32 to vector<2x16xf32>
    %272 = arith.mulf %271, %9 : vector<2x16xf32>
    %273 = arith.addf %269, %272 : vector<2x16xf32>
    %c3_136 = arith.constant 3 : index
    %c5_137 = arith.constant 5 : index
    %274 = memref.load %arg0[%c3_136, %c5_137] : memref<8x12xf32, #tpu.memory_space<smem>>
    %275 = vector.broadcast %274 : f32 to vector<2x16xf32>
    %276 = arith.mulf %275, %11 : vector<2x16xf32>
    %277 = arith.addf %273, %276 : vector<2x16xf32>
    %c3_138 = arith.constant 3 : index
    %c6_139 = arith.constant 6 : index
    %278 = memref.load %arg0[%c3_138, %c6_139] : memref<8x12xf32, #tpu.memory_space<smem>>
    %279 = vector.broadcast %278 : f32 to vector<2x16xf32>
    %280 = arith.mulf %279, %13 : vector<2x16xf32>
    %281 = arith.addf %277, %280 : vector<2x16xf32>
    %c3_140 = arith.constant 3 : index
    %c7_141 = arith.constant 7 : index
    %282 = memref.load %arg0[%c3_140, %c7_141] : memref<8x12xf32, #tpu.memory_space<smem>>
    %283 = vector.broadcast %282 : f32 to vector<2x16xf32>
    %284 = arith.mulf %283, %15 : vector<2x16xf32>
    %285 = arith.addf %281, %284 : vector<2x16xf32>
    %c3_142 = arith.constant 3 : index
    %c8_143 = arith.constant 8 : index
    %286 = memref.load %arg0[%c3_142, %c8_143] : memref<8x12xf32, #tpu.memory_space<smem>>
    %287 = vector.broadcast %286 : f32 to vector<2x16xf32>
    %288 = arith.mulf %287, %17 : vector<2x16xf32>
    %289 = arith.addf %285, %288 : vector<2x16xf32>
    %c3_144 = arith.constant 3 : index
    %c9_145 = arith.constant 9 : index
    %290 = memref.load %arg0[%c3_144, %c9_145] : memref<8x12xf32, #tpu.memory_space<smem>>
    %291 = vector.broadcast %290 : f32 to vector<2x16xf32>
    %292 = arith.mulf %291, %19 : vector<2x16xf32>
    %293 = arith.addf %289, %292 : vector<2x16xf32>
    %c3_146 = arith.constant 3 : index
    %c10_147 = arith.constant 10 : index
    %294 = memref.load %arg0[%c3_146, %c10_147] : memref<8x12xf32, #tpu.memory_space<smem>>
    %295 = vector.broadcast %294 : f32 to vector<2x16xf32>
    %296 = arith.mulf %295, %21 : vector<2x16xf32>
    %297 = arith.addf %293, %296 : vector<2x16xf32>
    %c3_148 = arith.constant 3 : index
    %c11_149 = arith.constant 11 : index
    %298 = memref.load %arg0[%c3_148, %c11_149] : memref<8x12xf32, #tpu.memory_space<smem>>
    %299 = vector.broadcast %298 : f32 to vector<2x16xf32>
    %300 = arith.mulf %299, %23 : vector<2x16xf32>
    %301 = arith.addf %297, %300 : vector<2x16xf32>
    %cst_150 = arith.constant dense<0.000000e+00> : vector<2xf32>
    %302 = vector.multi_reduction <add>, %301, %cst_150 [1] : vector<2x16xf32> to vector<2xf32>
    %303 = vector.shape_cast %302 : vector<2xf32> to vector<2x1xf32>
    %cst_151 = arith.constant dense<0.000000e+00> : vector<1xf32>
    %304 = vector.multi_reduction <add>, %303, %cst_151 [0] : vector<2x1xf32> to vector<1xf32>
    %305 = vector.shape_cast %304 : vector<1xf32> to vector<1x1xf32>
    %306 = arith.mulf %301, %301 : vector<2x16xf32>
    %cst_152 = arith.constant dense<0.000000e+00> : vector<2xf32>
    %307 = vector.multi_reduction <add>, %306, %cst_152 [1] : vector<2x16xf32> to vector<2xf32>
    %308 = vector.shape_cast %307 : vector<2xf32> to vector<2x1xf32>
    %cst_153 = arith.constant dense<0.000000e+00> : vector<1xf32>
    %309 = vector.multi_reduction <add>, %308, %cst_153 [0] : vector<2x1xf32> to vector<1xf32>
    %310 = vector.shape_cast %309 : vector<1xf32> to vector<1x1xf32>
    %cst_154 = arith.constant 3.125000e-02 : f32
    %311 = vector.broadcast %cst_154 : f32 to vector<1x1xf32>
    %312 = arith.mulf %305, %311 : vector<1x1xf32>
    %cst_155 = arith.constant 3.125000e-02 : f32
    %313 = vector.broadcast %cst_155 : f32 to vector<1x1xf32>
    %314 = arith.mulf %310, %313 : vector<1x1xf32>
    %315 = arith.mulf %312, %312 : vector<1x1xf32>
    %316 = arith.subf %314, %315 : vector<1x1xf32>
    %cst_156 = arith.constant 9.99999974E-6 : f32
    %317 = vector.broadcast %cst_156 : f32 to vector<1x1xf32>
    %318 = arith.addf %316, %317 : vector<1x1xf32>
    %319 = math.rsqrt %318 : vector<1x1xf32>
    %c3_157 = arith.constant 3 : index
    %320 = memref.load %arg1[%c3_157] : memref<8xf32, #tpu.memory_space<smem>>
    %321 = vector.broadcast %320 : f32 to vector<1x1xf32>
    %322 = arith.mulf %319, %321 : vector<1x1xf32>
    %c3_158 = arith.constant 3 : index
    %323 = memref.load %arg2[%c3_158] : memref<8xf32, #tpu.memory_space<smem>>
    %324 = arith.mulf %312, %322 : vector<1x1xf32>
    %325 = vector.broadcast %323 : f32 to vector<1x1xf32>
    %326 = arith.subf %325, %324 : vector<1x1xf32>
    %327 = vector.broadcast %322 : vector<1x1xf32> to vector<2x16xf32>
    %328 = arith.mulf %301, %327 : vector<2x16xf32>
    %329 = vector.broadcast %326 : vector<1x1xf32> to vector<2x16xf32>
    %330 = arith.addf %328, %329 : vector<2x16xf32>
    %c0_159 = arith.constant 0 : index
    %c48 = arith.constant 48 : index
    %331 = vector.load %arg4[%c0_159, %c48] : memref<2x128xf32, #tpu.memory_space<vmem>>, vector<2x16xf32>
    tpu.vector_store %arg4[%c0_159, %c48], %330 {strides = array<i32>} : memref<2x128xf32, #tpu.memory_space<vmem>>, vector<2x16xf32>,
    %c4_160 = arith.constant 4 : index
    %c0_161 = arith.constant 0 : index
    %332 = memref.load %arg0[%c4_160, %c0_161] : memref<8x12xf32, #tpu.memory_space<smem>>
    %333 = vector.broadcast %332 : f32 to vector<2x16xf32>
    %334 = arith.mulf %333, %1 : vector<2x16xf32>
    %c4_162 = arith.constant 4 : index
    %c1_163 = arith.constant 1 : index
    %335 = memref.load %arg0[%c4_162, %c1_163] : memref<8x12xf32, #tpu.memory_space<smem>>
    %336 = vector.broadcast %335 : f32 to vector<2x16xf32>
    %337 = arith.mulf %336, %3 : vector<2x16xf32>
    %338 = arith.addf %334, %337 : vector<2x16xf32>
    %c4_164 = arith.constant 4 : index
    %c2_165 = arith.constant 2 : index
    %339 = memref.load %arg0[%c4_164, %c2_165] : memref<8x12xf32, #tpu.memory_space<smem>>
    %340 = vector.broadcast %339 : f32 to vector<2x16xf32>
    %341 = arith.mulf %340, %5 : vector<2x16xf32>
    %342 = arith.addf %338, %341 : vector<2x16xf32>
    %c4_166 = arith.constant 4 : index
    %c3_167 = arith.constant 3 : index
    %343 = memref.load %arg0[%c4_166, %c3_167] : memref<8x12xf32, #tpu.memory_space<smem>>
    %344 = vector.broadcast %343 : f32 to vector<2x16xf32>
    %345 = arith.mulf %344, %7 : vector<2x16xf32>
    %346 = arith.addf %342, %345 : vector<2x16xf32>
    %c4_168 = arith.constant 4 : index
    %c4_169 = arith.constant 4 : index
    %347 = memref.load %arg0[%c4_168, %c4_169] : memref<8x12xf32, #tpu.memory_space<smem>>
    %348 = vector.broadcast %347 : f32 to vector<2x16xf32>
    %349 = arith.mulf %348, %9 : vector<2x16xf32>
    %350 = arith.addf %346, %349 : vector<2x16xf32>
    %c4_170 = arith.constant 4 : index
    %c5_171 = arith.constant 5 : index
    %351 = memref.load %arg0[%c4_170, %c5_171] : memref<8x12xf32, #tpu.memory_space<smem>>
    %352 = vector.broadcast %351 : f32 to vector<2x16xf32>
    %353 = arith.mulf %352, %11 : vector<2x16xf32>
    %354 = arith.addf %350, %353 : vector<2x16xf32>
    %c4_172 = arith.constant 4 : index
    %c6_173 = arith.constant 6 : index
    %355 = memref.load %arg0[%c4_172, %c6_173] : memref<8x12xf32, #tpu.memory_space<smem>>
    %356 = vector.broadcast %355 : f32 to vector<2x16xf32>
    %357 = arith.mulf %356, %13 : vector<2x16xf32>
    %358 = arith.addf %354, %357 : vector<2x16xf32>
    %c4_174 = arith.constant 4 : index
    %c7_175 = arith.constant 7 : index
    %359 = memref.load %arg0[%c4_174, %c7_175] : memref<8x12xf32, #tpu.memory_space<smem>>
    %360 = vector.broadcast %359 : f32 to vector<2x16xf32>
    %361 = arith.mulf %360, %15 : vector<2x16xf32>
    %362 = arith.addf %358, %361 : vector<2x16xf32>
    %c4_176 = arith.constant 4 : index
    %c8_177 = arith.constant 8 : index
    %363 = memref.load %arg0[%c4_176, %c8_177] : memref<8x12xf32, #tpu.memory_space<smem>>
    %364 = vector.broadcast %363 : f32 to vector<2x16xf32>
    %365 = arith.mulf %364, %17 : vector<2x16xf32>
    %366 = arith.addf %362, %365 : vector<2x16xf32>
    %c4_178 = arith.constant 4 : index
    %c9_179 = arith.constant 9 : index
    %367 = memref.load %arg0[%c4_178, %c9_179] : memref<8x12xf32, #tpu.memory_space<smem>>
    %368 = vector.broadcast %367 : f32 to vector<2x16xf32>
    %369 = arith.mulf %368, %19 : vector<2x16xf32>
    %370 = arith.addf %366, %369 : vector<2x16xf32>
    %c4_180 = arith.constant 4 : index
    %c10_181 = arith.constant 10 : index
    %371 = memref.load %arg0[%c4_180, %c10_181] : memref<8x12xf32, #tpu.memory_space<smem>>
    %372 = vector.broadcast %371 : f32 to vector<2x16xf32>
    %373 = arith.mulf %372, %21 : vector<2x16xf32>
    %374 = arith.addf %370, %373 : vector<2x16xf32>
    %c4_182 = arith.constant 4 : index
    %c11_183 = arith.constant 11 : index
    %375 = memref.load %arg0[%c4_182, %c11_183] : memref<8x12xf32, #tpu.memory_space<smem>>
    %376 = vector.broadcast %375 : f32 to vector<2x16xf32>
    %377 = arith.mulf %376, %23 : vector<2x16xf32>
    %378 = arith.addf %374, %377 : vector<2x16xf32>
    %cst_184 = arith.constant dense<0.000000e+00> : vector<2xf32>
    %379 = vector.multi_reduction <add>, %378, %cst_184 [1] : vector<2x16xf32> to vector<2xf32>
    %380 = vector.shape_cast %379 : vector<2xf32> to vector<2x1xf32>
    %cst_185 = arith.constant dense<0.000000e+00> : vector<1xf32>
    %381 = vector.multi_reduction <add>, %380, %cst_185 [0] : vector<2x1xf32> to vector<1xf32>
    %382 = vector.shape_cast %381 : vector<1xf32> to vector<1x1xf32>
    %383 = arith.mulf %378, %378 : vector<2x16xf32>
    %cst_186 = arith.constant dense<0.000000e+00> : vector<2xf32>
    %384 = vector.multi_reduction <add>, %383, %cst_186 [1] : vector<2x16xf32> to vector<2xf32>
    %385 = vector.shape_cast %384 : vector<2xf32> to vector<2x1xf32>
    %cst_187 = arith.constant dense<0.000000e+00> : vector<1xf32>
    %386 = vector.multi_reduction <add>, %385, %cst_187 [0] : vector<2x1xf32> to vector<1xf32>
    %387 = vector.shape_cast %386 : vector<1xf32> to vector<1x1xf32>
    %cst_188 = arith.constant 3.125000e-02 : f32
    %388 = vector.broadcast %cst_188 : f32 to vector<1x1xf32>
    %389 = arith.mulf %382, %388 : vector<1x1xf32>
    %cst_189 = arith.constant 3.125000e-02 : f32
    %390 = vector.broadcast %cst_189 : f32 to vector<1x1xf32>
    %391 = arith.mulf %387, %390 : vector<1x1xf32>
    %392 = arith.mulf %389, %389 : vector<1x1xf32>
    %393 = arith.subf %391, %392 : vector<1x1xf32>
    %cst_190 = arith.constant 9.99999974E-6 : f32
    %394 = vector.broadcast %cst_190 : f32 to vector<1x1xf32>
    %395 = arith.addf %393, %394 : vector<1x1xf32>
    %396 = math.rsqrt %395 : vector<1x1xf32>
    %c4_191 = arith.constant 4 : index
    %397 = memref.load %arg1[%c4_191] : memref<8xf32, #tpu.memory_space<smem>>
    %398 = vector.broadcast %397 : f32 to vector<1x1xf32>
    %399 = arith.mulf %396, %398 : vector<1x1xf32>
    %c4_192 = arith.constant 4 : index
    %400 = memref.load %arg2[%c4_192] : memref<8xf32, #tpu.memory_space<smem>>
    %401 = arith.mulf %389, %399 : vector<1x1xf32>
    %402 = vector.broadcast %400 : f32 to vector<1x1xf32>
    %403 = arith.subf %402, %401 : vector<1x1xf32>
    %404 = vector.broadcast %399 : vector<1x1xf32> to vector<2x16xf32>
    %405 = arith.mulf %378, %404 : vector<2x16xf32>
    %406 = vector.broadcast %403 : vector<1x1xf32> to vector<2x16xf32>
    %407 = arith.addf %405, %406 : vector<2x16xf32>
    %c0_193 = arith.constant 0 : index
    %c64 = arith.constant 64 : index
    %408 = vector.load %arg4[%c0_193, %c64] : memref<2x128xf32, #tpu.memory_space<vmem>>, vector<2x16xf32>
    tpu.vector_store %arg4[%c0_193, %c64], %407 {strides = array<i32>} : memref<2x128xf32, #tpu.memory_space<vmem>>, vector<2x16xf32>,
    %c5_194 = arith.constant 5 : index
    %c0_195 = arith.constant 0 : index
    %409 = memref.load %arg0[%c5_194, %c0_195] : memref<8x12xf32, #tpu.memory_space<smem>>
    %410 = vector.broadcast %409 : f32 to vector<2x16xf32>
    %411 = arith.mulf %410, %1 : vector<2x16xf32>
    %c5_196 = arith.constant 5 : index
    %c1_197 = arith.constant 1 : index
    %412 = memref.load %arg0[%c5_196, %c1_197] : memref<8x12xf32, #tpu.memory_space<smem>>
    %413 = vector.broadcast %412 : f32 to vector<2x16xf32>
    %414 = arith.mulf %413, %3 : vector<2x16xf32>
    %415 = arith.addf %411, %414 : vector<2x16xf32>
    %c5_198 = arith.constant 5 : index
    %c2_199 = arith.constant 2 : index
    %416 = memref.load %arg0[%c5_198, %c2_199] : memref<8x12xf32, #tpu.memory_space<smem>>
    %417 = vector.broadcast %416 : f32 to vector<2x16xf32>
    %418 = arith.mulf %417, %5 : vector<2x16xf32>
    %419 = arith.addf %415, %418 : vector<2x16xf32>
    %c5_200 = arith.constant 5 : index
    %c3_201 = arith.constant 3 : index
    %420 = memref.load %arg0[%c5_200, %c3_201] : memref<8x12xf32, #tpu.memory_space<smem>>
    %421 = vector.broadcast %420 : f32 to vector<2x16xf32>
    %422 = arith.mulf %421, %7 : vector<2x16xf32>
    %423 = arith.addf %419, %422 : vector<2x16xf32>
    %c5_202 = arith.constant 5 : index
    %c4_203 = arith.constant 4 : index
    %424 = memref.load %arg0[%c5_202, %c4_203] : memref<8x12xf32, #tpu.memory_space<smem>>
    %425 = vector.broadcast %424 : f32 to vector<2x16xf32>
    %426 = arith.mulf %425, %9 : vector<2x16xf32>
    %427 = arith.addf %423, %426 : vector<2x16xf32>
    %c5_204 = arith.constant 5 : index
    %c5_205 = arith.constant 5 : index
    %428 = memref.load %arg0[%c5_204, %c5_205] : memref<8x12xf32, #tpu.memory_space<smem>>
    %429 = vector.broadcast %428 : f32 to vector<2x16xf32>
    %430 = arith.mulf %429, %11 : vector<2x16xf32>
    %431 = arith.addf %427, %430 : vector<2x16xf32>
    %c5_206 = arith.constant 5 : index
    %c6_207 = arith.constant 6 : index
    %432 = memref.load %arg0[%c5_206, %c6_207] : memref<8x12xf32, #tpu.memory_space<smem>>
    %433 = vector.broadcast %432 : f32 to vector<2x16xf32>
    %434 = arith.mulf %433, %13 : vector<2x16xf32>
    %435 = arith.addf %431, %434 : vector<2x16xf32>
    %c5_208 = arith.constant 5 : index
    %c7_209 = arith.constant 7 : index
    %436 = memref.load %arg0[%c5_208, %c7_209] : memref<8x12xf32, #tpu.memory_space<smem>>
    %437 = vector.broadcast %436 : f32 to vector<2x16xf32>
    %438 = arith.mulf %437, %15 : vector<2x16xf32>
    %439 = arith.addf %435, %438 : vector<2x16xf32>
    %c5_210 = arith.constant 5 : index
    %c8_211 = arith.constant 8 : index
    %440 = memref.load %arg0[%c5_210, %c8_211] : memref<8x12xf32, #tpu.memory_space<smem>>
    %441 = vector.broadcast %440 : f32 to vector<2x16xf32>
    %442 = arith.mulf %441, %17 : vector<2x16xf32>
    %443 = arith.addf %439, %442 : vector<2x16xf32>
    %c5_212 = arith.constant 5 : index
    %c9_213 = arith.constant 9 : index
    %444 = memref.load %arg0[%c5_212, %c9_213] : memref<8x12xf32, #tpu.memory_space<smem>>
    %445 = vector.broadcast %444 : f32 to vector<2x16xf32>
    %446 = arith.mulf %445, %19 : vector<2x16xf32>
    %447 = arith.addf %443, %446 : vector<2x16xf32>
    %c5_214 = arith.constant 5 : index
    %c10_215 = arith.constant 10 : index
    %448 = memref.load %arg0[%c5_214, %c10_215] : memref<8x12xf32, #tpu.memory_space<smem>>
    %449 = vector.broadcast %448 : f32 to vector<2x16xf32>
    %450 = arith.mulf %449, %21 : vector<2x16xf32>
    %451 = arith.addf %447, %450 : vector<2x16xf32>
    %c5_216 = arith.constant 5 : index
    %c11_217 = arith.constant 11 : index
    %452 = memref.load %arg0[%c5_216, %c11_217] : memref<8x12xf32, #tpu.memory_space<smem>>
    %453 = vector.broadcast %452 : f32 to vector<2x16xf32>
    %454 = arith.mulf %453, %23 : vector<2x16xf32>
    %455 = arith.addf %451, %454 : vector<2x16xf32>
    %cst_218 = arith.constant dense<0.000000e+00> : vector<2xf32>
    %456 = vector.multi_reduction <add>, %455, %cst_218 [1] : vector<2x16xf32> to vector<2xf32>
    %457 = vector.shape_cast %456 : vector<2xf32> to vector<2x1xf32>
    %cst_219 = arith.constant dense<0.000000e+00> : vector<1xf32>
    %458 = vector.multi_reduction <add>, %457, %cst_219 [0] : vector<2x1xf32> to vector<1xf32>
    %459 = vector.shape_cast %458 : vector<1xf32> to vector<1x1xf32>
    %460 = arith.mulf %455, %455 : vector<2x16xf32>
    %cst_220 = arith.constant dense<0.000000e+00> : vector<2xf32>
    %461 = vector.multi_reduction <add>, %460, %cst_220 [1] : vector<2x16xf32> to vector<2xf32>
    %462 = vector.shape_cast %461 : vector<2xf32> to vector<2x1xf32>
    %cst_221 = arith.constant dense<0.000000e+00> : vector<1xf32>
    %463 = vector.multi_reduction <add>, %462, %cst_221 [0] : vector<2x1xf32> to vector<1xf32>
    %464 = vector.shape_cast %463 : vector<1xf32> to vector<1x1xf32>
    %cst_222 = arith.constant 3.125000e-02 : f32
    %465 = vector.broadcast %cst_222 : f32 to vector<1x1xf32>
    %466 = arith.mulf %459, %465 : vector<1x1xf32>
    %cst_223 = arith.constant 3.125000e-02 : f32
    %467 = vector.broadcast %cst_223 : f32 to vector<1x1xf32>
    %468 = arith.mulf %464, %467 : vector<1x1xf32>
    %469 = arith.mulf %466, %466 : vector<1x1xf32>
    %470 = arith.subf %468, %469 : vector<1x1xf32>
    %cst_224 = arith.constant 9.99999974E-6 : f32
    %471 = vector.broadcast %cst_224 : f32 to vector<1x1xf32>
    %472 = arith.addf %470, %471 : vector<1x1xf32>
    %473 = math.rsqrt %472 : vector<1x1xf32>
    %c5_225 = arith.constant 5 : index
    %474 = memref.load %arg1[%c5_225] : memref<8xf32, #tpu.memory_space<smem>>
    %475 = vector.broadcast %474 : f32 to vector<1x1xf32>
    %476 = arith.mulf %473, %475 : vector<1x1xf32>
    %c5_226 = arith.constant 5 : index
    %477 = memref.load %arg2[%c5_226] : memref<8xf32, #tpu.memory_space<smem>>
    %478 = arith.mulf %466, %476 : vector<1x1xf32>
    %479 = vector.broadcast %477 : f32 to vector<1x1xf32>
    %480 = arith.subf %479, %478 : vector<1x1xf32>
    %481 = vector.broadcast %476 : vector<1x1xf32> to vector<2x16xf32>
    %482 = arith.mulf %455, %481 : vector<2x16xf32>
    %483 = vector.broadcast %480 : vector<1x1xf32> to vector<2x16xf32>
    %484 = arith.addf %482, %483 : vector<2x16xf32>
    %c0_227 = arith.constant 0 : index
    %c80 = arith.constant 80 : index
    %485 = vector.load %arg4[%c0_227, %c80] : memref<2x128xf32, #tpu.memory_space<vmem>>, vector<2x16xf32>
    tpu.vector_store %arg4[%c0_227, %c80], %484 {strides = array<i32>} : memref<2x128xf32, #tpu.memory_space<vmem>>, vector<2x16xf32>,
    %c6_228 = arith.constant 6 : index
    %c0_229 = arith.constant 0 : index
    %486 = memref.load %arg0[%c6_228, %c0_229] : memref<8x12xf32, #tpu.memory_space<smem>>
    %487 = vector.broadcast %486 : f32 to vector<2x16xf32>
    %488 = arith.mulf %487, %1 : vector<2x16xf32>
    %c6_230 = arith.constant 6 : index
    %c1_231 = arith.constant 1 : index
    %489 = memref.load %arg0[%c6_230, %c1_231] : memref<8x12xf32, #tpu.memory_space<smem>>
    %490 = vector.broadcast %489 : f32 to vector<2x16xf32>
    %491 = arith.mulf %490, %3 : vector<2x16xf32>
    %492 = arith.addf %488, %491 : vector<2x16xf32>
    %c6_232 = arith.constant 6 : index
    %c2_233 = arith.constant 2 : index
    %493 = memref.load %arg0[%c6_232, %c2_233] : memref<8x12xf32, #tpu.memory_space<smem>>
    %494 = vector.broadcast %493 : f32 to vector<2x16xf32>
    %495 = arith.mulf %494, %5 : vector<2x16xf32>
    %496 = arith.addf %492, %495 : vector<2x16xf32>
    %c6_234 = arith.constant 6 : index
    %c3_235 = arith.constant 3 : index
    %497 = memref.load %arg0[%c6_234, %c3_235] : memref<8x12xf32, #tpu.memory_space<smem>>
    %498 = vector.broadcast %497 : f32 to vector<2x16xf32>
    %499 = arith.mulf %498, %7 : vector<2x16xf32>
    %500 = arith.addf %496, %499 : vector<2x16xf32>
    %c6_236 = arith.constant 6 : index
    %c4_237 = arith.constant 4 : index
    %501 = memref.load %arg0[%c6_236, %c4_237] : memref<8x12xf32, #tpu.memory_space<smem>>
    %502 = vector.broadcast %501 : f32 to vector<2x16xf32>
    %503 = arith.mulf %502, %9 : vector<2x16xf32>
    %504 = arith.addf %500, %503 : vector<2x16xf32>
    %c6_238 = arith.constant 6 : index
    %c5_239 = arith.constant 5 : index
    %505 = memref.load %arg0[%c6_238, %c5_239] : memref<8x12xf32, #tpu.memory_space<smem>>
    %506 = vector.broadcast %505 : f32 to vector<2x16xf32>
    %507 = arith.mulf %506, %11 : vector<2x16xf32>
    %508 = arith.addf %504, %507 : vector<2x16xf32>
    %c6_240 = arith.constant 6 : index
    %c6_241 = arith.constant 6 : index
    %509 = memref.load %arg0[%c6_240, %c6_241] : memref<8x12xf32, #tpu.memory_space<smem>>
    %510 = vector.broadcast %509 : f32 to vector<2x16xf32>
    %511 = arith.mulf %510, %13 : vector<2x16xf32>
    %512 = arith.addf %508, %511 : vector<2x16xf32>
    %c6_242 = arith.constant 6 : index
    %c7_243 = arith.constant 7 : index
    %513 = memref.load %arg0[%c6_242, %c7_243] : memref<8x12xf32, #tpu.memory_space<smem>>
    %514 = vector.broadcast %513 : f32 to vector<2x16xf32>
    %515 = arith.mulf %514, %15 : vector<2x16xf32>
    %516 = arith.addf %512, %515 : vector<2x16xf32>
    %c6_244 = arith.constant 6 : index
    %c8_245 = arith.constant 8 : index
    %517 = memref.load %arg0[%c6_244, %c8_245] : memref<8x12xf32, #tpu.memory_space<smem>>
    %518 = vector.broadcast %517 : f32 to vector<2x16xf32>
    %519 = arith.mulf %518, %17 : vector<2x16xf32>
    %520 = arith.addf %516, %519 : vector<2x16xf32>
    %c6_246 = arith.constant 6 : index
    %c9_247 = arith.constant 9 : index
    %521 = memref.load %arg0[%c6_246, %c9_247] : memref<8x12xf32, #tpu.memory_space<smem>>
    %522 = vector.broadcast %521 : f32 to vector<2x16xf32>
    %523 = arith.mulf %522, %19 : vector<2x16xf32>
    %524 = arith.addf %520, %523 : vector<2x16xf32>
    %c6_248 = arith.constant 6 : index
    %c10_249 = arith.constant 10 : index
    %525 = memref.load %arg0[%c6_248, %c10_249] : memref<8x12xf32, #tpu.memory_space<smem>>
    %526 = vector.broadcast %525 : f32 to vector<2x16xf32>
    %527 = arith.mulf %526, %21 : vector<2x16xf32>
    %528 = arith.addf %524, %527 : vector<2x16xf32>
    %c6_250 = arith.constant 6 : index
    %c11_251 = arith.constant 11 : index
    %529 = memref.load %arg0[%c6_250, %c11_251] : memref<8x12xf32, #tpu.memory_space<smem>>
    %530 = vector.broadcast %529 : f32 to vector<2x16xf32>
    %531 = arith.mulf %530, %23 : vector<2x16xf32>
    %532 = arith.addf %528, %531 : vector<2x16xf32>
    %cst_252 = arith.constant dense<0.000000e+00> : vector<2xf32>
    %533 = vector.multi_reduction <add>, %532, %cst_252 [1] : vector<2x16xf32> to vector<2xf32>
    %534 = vector.shape_cast %533 : vector<2xf32> to vector<2x1xf32>
    %cst_253 = arith.constant dense<0.000000e+00> : vector<1xf32>
    %535 = vector.multi_reduction <add>, %534, %cst_253 [0] : vector<2x1xf32> to vector<1xf32>
    %536 = vector.shape_cast %535 : vector<1xf32> to vector<1x1xf32>
    %537 = arith.mulf %532, %532 : vector<2x16xf32>
    %cst_254 = arith.constant dense<0.000000e+00> : vector<2xf32>
    %538 = vector.multi_reduction <add>, %537, %cst_254 [1] : vector<2x16xf32> to vector<2xf32>
    %539 = vector.shape_cast %538 : vector<2xf32> to vector<2x1xf32>
    %cst_255 = arith.constant dense<0.000000e+00> : vector<1xf32>
    %540 = vector.multi_reduction <add>, %539, %cst_255 [0] : vector<2x1xf32> to vector<1xf32>
    %541 = vector.shape_cast %540 : vector<1xf32> to vector<1x1xf32>
    %cst_256 = arith.constant 3.125000e-02 : f32
    %542 = vector.broadcast %cst_256 : f32 to vector<1x1xf32>
    %543 = arith.mulf %536, %542 : vector<1x1xf32>
    %cst_257 = arith.constant 3.125000e-02 : f32
    %544 = vector.broadcast %cst_257 : f32 to vector<1x1xf32>
    %545 = arith.mulf %541, %544 : vector<1x1xf32>
    %546 = arith.mulf %543, %543 : vector<1x1xf32>
    %547 = arith.subf %545, %546 : vector<1x1xf32>
    %cst_258 = arith.constant 9.99999974E-6 : f32
    %548 = vector.broadcast %cst_258 : f32 to vector<1x1xf32>
    %549 = arith.addf %547, %548 : vector<1x1xf32>
    %550 = math.rsqrt %549 : vector<1x1xf32>
    %c6_259 = arith.constant 6 : index
    %551 = memref.load %arg1[%c6_259] : memref<8xf32, #tpu.memory_space<smem>>
    %552 = vector.broadcast %551 : f32 to vector<1x1xf32>
    %553 = arith.mulf %550, %552 : vector<1x1xf32>
    %c6_260 = arith.constant 6 : index
    %554 = memref.load %arg2[%c6_260] : memref<8xf32, #tpu.memory_space<smem>>
    %555 = arith.mulf %543, %553 : vector<1x1xf32>
    %556 = vector.broadcast %554 : f32 to vector<1x1xf32>
    %557 = arith.subf %556, %555 : vector<1x1xf32>
    %558 = vector.broadcast %553 : vector<1x1xf32> to vector<2x16xf32>
    %559 = arith.mulf %532, %558 : vector<2x16xf32>
    %560 = vector.broadcast %557 : vector<1x1xf32> to vector<2x16xf32>
    %561 = arith.addf %559, %560 : vector<2x16xf32>
    %c0_261 = arith.constant 0 : index
    %c96 = arith.constant 96 : index
    %562 = vector.load %arg4[%c0_261, %c96] : memref<2x128xf32, #tpu.memory_space<vmem>>, vector<2x16xf32>
    tpu.vector_store %arg4[%c0_261, %c96], %561 {strides = array<i32>} : memref<2x128xf32, #tpu.memory_space<vmem>>, vector<2x16xf32>,
    %c7_262 = arith.constant 7 : index
    %c0_263 = arith.constant 0 : index
    %563 = memref.load %arg0[%c7_262, %c0_263] : memref<8x12xf32, #tpu.memory_space<smem>>
    %564 = vector.broadcast %563 : f32 to vector<2x16xf32>
    %565 = arith.mulf %564, %1 : vector<2x16xf32>
    %c7_264 = arith.constant 7 : index
    %c1_265 = arith.constant 1 : index
    %566 = memref.load %arg0[%c7_264, %c1_265] : memref<8x12xf32, #tpu.memory_space<smem>>
    %567 = vector.broadcast %566 : f32 to vector<2x16xf32>
    %568 = arith.mulf %567, %3 : vector<2x16xf32>
    %569 = arith.addf %565, %568 : vector<2x16xf32>
    %c7_266 = arith.constant 7 : index
    %c2_267 = arith.constant 2 : index
    %570 = memref.load %arg0[%c7_266, %c2_267] : memref<8x12xf32, #tpu.memory_space<smem>>
    %571 = vector.broadcast %570 : f32 to vector<2x16xf32>
    %572 = arith.mulf %571, %5 : vector<2x16xf32>
    %573 = arith.addf %569, %572 : vector<2x16xf32>
    %c7_268 = arith.constant 7 : index
    %c3_269 = arith.constant 3 : index
    %574 = memref.load %arg0[%c7_268, %c3_269] : memref<8x12xf32, #tpu.memory_space<smem>>
    %575 = vector.broadcast %574 : f32 to vector<2x16xf32>
    %576 = arith.mulf %575, %7 : vector<2x16xf32>
    %577 = arith.addf %573, %576 : vector<2x16xf32>
    %c7_270 = arith.constant 7 : index
    %c4_271 = arith.constant 4 : index
    %578 = memref.load %arg0[%c7_270, %c4_271] : memref<8x12xf32, #tpu.memory_space<smem>>
    %579 = vector.broadcast %578 : f32 to vector<2x16xf32>
    %580 = arith.mulf %579, %9 : vector<2x16xf32>
    %581 = arith.addf %577, %580 : vector<2x16xf32>
    %c7_272 = arith.constant 7 : index
    %c5_273 = arith.constant 5 : index
    %582 = memref.load %arg0[%c7_272, %c5_273] : memref<8x12xf32, #tpu.memory_space<smem>>
    %583 = vector.broadcast %582 : f32 to vector<2x16xf32>
    %584 = arith.mulf %583, %11 : vector<2x16xf32>
    %585 = arith.addf %581, %584 : vector<2x16xf32>
    %c7_274 = arith.constant 7 : index
    %c6_275 = arith.constant 6 : index
    %586 = memref.load %arg0[%c7_274, %c6_275] : memref<8x12xf32, #tpu.memory_space<smem>>
    %587 = vector.broadcast %586 : f32 to vector<2x16xf32>
    %588 = arith.mulf %587, %13 : vector<2x16xf32>
    %589 = arith.addf %585, %588 : vector<2x16xf32>
    %c7_276 = arith.constant 7 : index
    %c7_277 = arith.constant 7 : index
    %590 = memref.load %arg0[%c7_276, %c7_277] : memref<8x12xf32, #tpu.memory_space<smem>>
    %591 = vector.broadcast %590 : f32 to vector<2x16xf32>
    %592 = arith.mulf %591, %15 : vector<2x16xf32>
    %593 = arith.addf %589, %592 : vector<2x16xf32>
    %c7_278 = arith.constant 7 : index
    %c8_279 = arith.constant 8 : index
    %594 = memref.load %arg0[%c7_278, %c8_279] : memref<8x12xf32, #tpu.memory_space<smem>>
    %595 = vector.broadcast %594 : f32 to vector<2x16xf32>
    %596 = arith.mulf %595, %17 : vector<2x16xf32>
    %597 = arith.addf %593, %596 : vector<2x16xf32>
    %c7_280 = arith.constant 7 : index
    %c9_281 = arith.constant 9 : index
    %598 = memref.load %arg0[%c7_280, %c9_281] : memref<8x12xf32, #tpu.memory_space<smem>>
    %599 = vector.broadcast %598 : f32 to vector<2x16xf32>
    %600 = arith.mulf %599, %19 : vector<2x16xf32>
    %601 = arith.addf %597, %600 : vector<2x16xf32>
    %c7_282 = arith.constant 7 : index
    %c10_283 = arith.constant 10 : index
    %602 = memref.load %arg0[%c7_282, %c10_283] : memref<8x12xf32, #tpu.memory_space<smem>>
    %603 = vector.broadcast %602 : f32 to vector<2x16xf32>
    %604 = arith.mulf %603, %21 : vector<2x16xf32>
    %605 = arith.addf %601, %604 : vector<2x16xf32>
    %c7_284 = arith.constant 7 : index
    %c11_285 = arith.constant 11 : index
    %606 = memref.load %arg0[%c7_284, %c11_285] : memref<8x12xf32, #tpu.memory_space<smem>>
    %607 = vector.broadcast %606 : f32 to vector<2x16xf32>
    %608 = arith.mulf %607, %23 : vector<2x16xf32>
    %609 = arith.addf %605, %608 : vector<2x16xf32>
    %cst_286 = arith.constant dense<0.000000e+00> : vector<2xf32>
    %610 = vector.multi_reduction <add>, %609, %cst_286 [1] : vector<2x16xf32> to vector<2xf32>
    %611 = vector.shape_cast %610 : vector<2xf32> to vector<2x1xf32>
    %cst_287 = arith.constant dense<0.000000e+00> : vector<1xf32>
    %612 = vector.multi_reduction <add>, %611, %cst_287 [0] : vector<2x1xf32> to vector<1xf32>
    %613 = vector.shape_cast %612 : vector<1xf32> to vector<1x1xf32>
    %614 = arith.mulf %609, %609 : vector<2x16xf32>
    %cst_288 = arith.constant dense<0.000000e+00> : vector<2xf32>
    %615 = vector.multi_reduction <add>, %614, %cst_288 [1] : vector<2x16xf32> to vector<2xf32>
    %616 = vector.shape_cast %615 : vector<2xf32> to vector<2x1xf32>
    %cst_289 = arith.constant dense<0.000000e+00> : vector<1xf32>
    %617 = vector.multi_reduction <add>, %616, %cst_289 [0] : vector<2x1xf32> to vector<1xf32>
    %618 = vector.shape_cast %617 : vector<1xf32> to vector<1x1xf32>
    %cst_290 = arith.constant 3.125000e-02 : f32
    %619 = vector.broadcast %cst_290 : f32 to vector<1x1xf32>
    %620 = arith.mulf %613, %619 : vector<1x1xf32>
    %cst_291 = arith.constant 3.125000e-02 : f32
    %621 = vector.broadcast %cst_291 : f32 to vector<1x1xf32>
    %622 = arith.mulf %618, %621 : vector<1x1xf32>
    %623 = arith.mulf %620, %620 : vector<1x1xf32>
    %624 = arith.subf %622, %623 : vector<1x1xf32>
    %cst_292 = arith.constant 9.99999974E-6 : f32
    %625 = vector.broadcast %cst_292 : f32 to vector<1x1xf32>
    %626 = arith.addf %624, %625 : vector<1x1xf32>
    %627 = math.rsqrt %626 : vector<1x1xf32>
    %c7_293 = arith.constant 7 : index
    %628 = memref.load %arg1[%c7_293] : memref<8xf32, #tpu.memory_space<smem>>
    %629 = vector.broadcast %628 : f32 to vector<1x1xf32>
    %630 = arith.mulf %627, %629 : vector<1x1xf32>
    %c7_294 = arith.constant 7 : index
    %631 = memref.load %arg2[%c7_294] : memref<8xf32, #tpu.memory_space<smem>>
    %632 = arith.mulf %620, %630 : vector<1x1xf32>
    %633 = vector.broadcast %631 : f32 to vector<1x1xf32>
    %634 = arith.subf %633, %632 : vector<1x1xf32>
    %635 = vector.broadcast %630 : vector<1x1xf32> to vector<2x16xf32>
    %636 = arith.mulf %609, %635 : vector<2x16xf32>
    %637 = vector.broadcast %634 : vector<1x1xf32> to vector<2x16xf32>
    %638 = arith.addf %636, %637 : vector<2x16xf32>
    %c0_295 = arith.constant 0 : index
    %c112 = arith.constant 112 : index
    %639 = vector.load %arg4[%c0_295, %c112] : memref<2x128xf32, #tpu.memory_space<vmem>>, vector<2x16xf32>
    tpu.vector_store %arg4[%c0_295, %c112], %638 {strides = array<i32>} : memref<2x128xf32, #tpu.memory_space<vmem>>, vector<2x16xf32>,
    return
  }
}

</mosaic_0001>

<bundles_post_ra>
// kernel: tpu_custom_call.1
= control target key start
LH: loop header
LB: loop body
LE: loop exit
PB: predicated region body
PF: predicated region fallthrough
CT: control target
= control target key end

     0   :  { %9 = vsyncpa [#allocation5], 0  ;;  %s1749_s0 = inlined_call_operand.hbm [shape: f32[8,12], index: 0, kind: input, shape index: {}]   ;;  %s1750_s1 = inlined_call_operand.vmem [shape: f32[8], index: 1, kind: input, shape index: {}]   ;;  %s1751_s2 = inlined_call_operand.vmem [shape: f32[8], index: 2, kind: input, shape index: {}]   ;;  %s1752_s3 = inlined_call_operand.hbm [shape: f32[4,2,18], index: 3, kind: input, shape index: {}]   ;;  %s1753_s4 = inlined_call_operand.hbm [shape: f32[2,128], index: 4, kind: output, shape index: {}]  }
   0x1   :  { %10 = vsyncpa [#allocation6], 0 }
   0x2   :  { %11 = vsyncpa [#allocation9], 0 }
   0x3   :  { %12 = vsyncpa [#allocation3], 0 }
   0x4   :  { %13 = vsyncpa [#allocation4], 0  ;;  %s28_s17 = sshll.u32 %s1750_s1, 4  ;;  %s1280_s18 = smov [#allocation2]   ;;  %s29_s17 = int_to_ptr.vmem [resolvable:$true] %s28_s17 }
   0x5   :  { %21 = dma.hbm_to_smem %s1749_s0, 128, %s1280_s18, [#allocation5]  }
   0x6   :  { %s1206_s21 = scalar_lea.vmem %s29_s17, 16  ;;  %p1211_p1 = scmp.lt.s32.totalorder %s29_s17, %s29_s17 }
   0x7   :  { %p1207_p0 = scmp.ne.s32.totalorder %s29_s17, %s1206_s21  ;;  %p1212_p2 = scmp.lt.s32.totalorder %s1206_s21, %s1206_s21 }
   0x9   :  { %p1213_p3 = por %p1212_p2, %p1211_p1 }
   0xb   :  { %p1214_p4 = pnand %p1213_p3, %p1207_p0 }
   0xd   :  { %1217 = shalt.err (!%p1214_p4)
}
   0xe   :  { %s1281_s22 = smov [#allocation7]   ;;  %s38_s25 = sshll.u32 %s1751_s2, 4  ;;  %s39_s25 = int_to_ptr.vmem [resolvable:$true] %s38_s25 }
   0xf   :  { %31 = dma.vmem_to_smem %s29_s17, 16, %s1281_s22, [#allocation6]  }
  0x10   :  { %s1218_s1 = scalar_lea.vmem %s39_s25, 16  ;;  %p1223_p6 = scmp.lt.s32.totalorder %s39_s25, %s39_s25 }
  0x11   :  { %p1219_p5 = scmp.ne.s32.totalorder %s39_s25, %s1218_s1  ;;  %p1224_p7 = scmp.lt.s32.totalorder %s1218_s1, %s1218_s1 }
  0x13   :  { %p1225_p8 = por %p1224_p7, %p1223_p6 }
  0x15   :  { %p1226_p9 = pnand %p1225_p8, %p1219_p5 }
  0x17   :  { %1229 = shalt.err (!%p1226_p9)
}
  0x18   :  { %s1282_s0 = smov [#allocation8]   ;;  %s1283_s26 = smov [#allocation10]  }
  0x19   :  { %41 = dma.vmem_to_smem %s39_s25, 16, %s1282_s0, [#allocation9]  }
  0x1a   :  { %s47_s27 = sshll.u32 %s1283_s26, 4  ;;  %s48_s27 = int_to_ptr.vmem [resolvable:$true] %s47_s27 }
  0x1b   :  { %s1238_s28 = scalar_lea.vmem %s48_s27, 128  ;;  %p1243_p11 = scmp.lt.s32.totalorder %s48_s27, %s48_s27 }
  0x1c   :  { %p1239_p10 = scmp.ne.s32.totalorder %s48_s27, %s1238_s28  ;;  %p1244_p12 = scmp.lt.s32.totalorder %s1238_s28, %s1238_s28 }
  0x1e   :  { %p1245_p13 = por %p1244_p12, %p1243_p11 }
  0x20   :  { %p1246_p0 = pnand %p1245_p13, %p1239_p10 }
  0x22   :  { %1249 = shalt.err (!%p1246_p0)
}
  0x23   :  { %s1284_s2 = smov 32   ;;  %s1285_s29 = smov 2  }
  0x24   :  { %53 = dma.hbm_to_vmem [thread:$0]  %s1752_s3, 128, %s48_s27, [#allocation3], %s1284_s2, %s1284_s2, %s1285_s29  }
  0x25   :  { %1270 = dma.done.wait [#allocation5], 128  }
  0x26   :  { %1271 = vsyncadd [#allocation5], 4294967168 }
  0x27   :  { %1272 = dma.done.wait [#allocation6], 16  }
  0x28   :  { %1273 = vsyncadd [#allocation6], 4294967280 }
  0x29   :  { %1274 = dma.done.wait [#allocation9], 16  }
  0x2a   :  { %1275 = vsyncadd [#allocation9], 4294967280 }
  0x2b   :  { %1276 = dma.done.wait [#allocation3], 128  }
  0x2c   :  { %1277 = vsyncadd [#allocation3], 4294967168 }
  0x2d   :  { %66 = sfence }
  0x2e   :  { %s1057_s6 = sld [smem:[#allocation2 + $0x1]]  ;;  %v1334_v0 = vld [vmem:[#allocation10] sm:$0x3]  ;;  %v1336_v1 = vld [vmem:[#allocation10 + $0x2] sm:$0x3]  ;;  %s1286_s13 = smov 127  }
  0x2f   :  { %s1060_s7 = sld [smem:[#allocation2 + $0x4]]  ;;  %v1344_v10 = vld [vmem:[#allocation10 + $0x4] sm:$0x3]  ;;  %s1287_s16 = smov 126   ;;  %v1350_v15 = vld [vmem:[#allocation10 + $0x6] sm:$0x3] }
  0x30   :  { %s1058_s8 = sld [smem:[#allocation2 + $0x2]]  ;;  %vm153_vm0 = vcmask 123904   ;;  %vm157_vm1 = vcmask 1041408   ;;  %vm311_vm2 = vcmask 255104   ;;  %vm432_vm3 = vcmask 386304  }
  0x31   :  { %s1061_s9 = sld [smem:[#allocation2 + $0x5]]  ;;  %vm553_vm4 = vcmask 517504   ;;  %vm674_vm5 = vcmask 648704   ;;  %vm795_vm6 = vcmask 779904   ;;  %vm916_vm7 = vcmask 911104  }
  0x32   :  { %s1063_s10 = sld [smem:[#allocation2 + $0x7]]  ;;  %vm1037_vm8 = vcmask 1042304  }
  0x33   :  { %s1064_s11 = sld [smem:[#allocation2 + $0x8]] }
  0x34   :  { %v78_v2 = vstv %s1057_s6  ;;  %s1066_s3 = sld [smem:[#allocation2 + $0xa]] }
  0x35   :  { %v79_v3 = vmul.f32 %v78_v2, %v1334_v0  ;;  %v98_v4 = vstv %s1060_s7  ;;  %s1067_s12 = sld [smem:[#allocation2 + $0xb]] }
  0x36   :  { %v99_v5 = vmul.f32 %v98_v4, %v1336_v1  ;;  %v86_v6 = vstv %s1058_s8  ;;  %s1069_s14 = sld [smem:[#allocation2 + $0x81]] }
  0x37   :  { %81 = vrot.lane.b32.xlu0 %v79_v3, %s1286_s13  ;;  %v87_v7 = vmul.f32 %v86_v6, %v1334_v0  ;;  %v106_v8 = vstv %s1061_s9  ;;  %s1070_s15 = sld [smem:[#allocation2 + $0x82]] }
  0x38   :  { %101 = vrot.lane.b32.xlu1 %v99_v5, %s1286_s13  ;;  %v107_v9 = vmul.f32 %v106_v8, %v1336_v1  ;;  %v118_v11 = vstv %s1063_s10  ;;  %s1072_s17 = sld [smem:[#allocation2 + $0x84]] }
  0x39   :  { %v126_v12 = vstv %s1064_s11  ;;  %v119_v13 = vmul.f32 %v118_v11, %v1344_v10  ;;  %s1073_s18 = sld [smem:[#allocation2 + $0x85]] }
  0x3a   :  { %v127_v14 = vmul.f32 %v126_v12, %v1344_v10  ;;  %v138_v16 = vstv %s1066_s3  ;;  %s1075_s19 = sld [smem:[#allocation2 + $0x87]] }
  0x3b   :  { %89 = vrot.lane.b32.xlu0 %v87_v7, %s1287_s16  ;;  %v146_v17 = vstv %s1067_s12  ;;  %v139_v18 = vmul.f32 %v138_v16, %v1350_v15  ;;  %s1076_s20 = sld [smem:[#allocation2 + $0x88]] }
  0x3c   :  { %109 = vrot.lane.b32.xlu1 %v107_v9, %s1287_s16  ;;  %v147_v19 = vmul.f32 %v146_v17, %v1350_v15  ;;  %v196_v20 = vstv %s1069_s14  ;;  %s1078_s21 = sld [smem:[#allocation2 + $0x8a]] }
  0x3d   :  { %v204_v21 = vstv %s1070_s15  ;;  %v197_v22 = vmul.f32 %v196_v20, %v1334_v0  ;;  %s1079_s22 = sld [smem:[#allocation2 + $0x8b]] }
  0x3e   :  { %v205_v23 = vmul.f32 %v204_v21, %v1334_v0  ;;  %v216_v24 = vstv %s1072_s17  ;;  %s1084_s23 = sld [smem:[#allocation2 + $0x102]] }
  0x3f   :  { %121 = vrot.lane.b32.xlu0 %v119_v13, %s1286_s13  ;;  %v224_v25 = vstv %s1073_s18  ;;  %v217_v26 = vmul.f32 %v216_v24, %v1336_v1  ;;  %s1083_s24 = sld [smem:[#allocation2 + $0x101]] }
  0x40   :  { %129 = vrot.lane.b32.xlu1 %v127_v14, %s1287_s16  ;;  %v225_v27 = vmul.f32 %v224_v25, %v1336_v1  ;;  %v236_v28 = vstv %s1075_s19  ;;  %s1087_s25 = sld [smem:[#allocation2 + $0x105]] }
  0x41   :  { %v244_v29 = vstv %s1076_s20  ;;  %v237_v30 = vmul.f32 %v236_v28, %v1344_v10  ;;  %s1086_s1 = sld [smem:[#allocation2 + $0x104]] }
  0x42   :  { %v245_v31 = vmul.f32 %v244_v29, %v1344_v10  ;;  %v256_v32 = vstv %s1078_s21  ;;  %s1090_s0 = sld [smem:[#allocation2 + $0x108]] }
  0x43   :  { %141 = vrot.lane.b32.xlu0 %v139_v18, %s1286_s13  ;;  %v264_v33 = vstv %s1079_s22  ;;  %v257_v34 = vmul.f32 %v256_v32, %v1350_v15  ;;  %s1089_s26 = sld [smem:[#allocation2 + $0x107]] }
  0x44   :  { %149 = vrot.lane.b32.xlu1 %v147_v19, %s1287_s16  ;;  %v265_v35 = vmul.f32 %v264_v33, %v1350_v15  ;;  %v325_v36 = vstv %s1084_s23  ;;  %s1097_s27 = sld [smem:[#allocation2 + $0x181]] }
  0x45   :  { %v317_v37 = vstv %s1083_s24  ;;  %v326_v38 = vmul.f32 %v325_v36, %v1334_v0  ;;  %s1092_s28 = sld [smem:[#allocation2 + $0x10a]] }
  0x46   :  { %v318_v39 = vmul.f32 %v317_v37, %v1334_v0  ;;  %v345_v40 = vstv %s1087_s25  ;;  %s1098_s29 = sld [smem:[#allocation2 + $0x182]] }
  0x47   :  { %199 = vrot.lane.b32.xlu0 %v197_v22, %s1286_s13  ;;  %v337_v41 = vstv %s1086_s1  ;;  %v346_v42 = vmul.f32 %v345_v40, %v1336_v1  ;;  %s1111_s30 = sld [smem:[#allocation2 + $0x201]] }
  0x48   :  { %207 = vrot.lane.b32.xlu1 %v205_v23, %s1287_s16  ;;  %v338_v43 = vmul.f32 %v337_v41, %v1336_v1  ;;  %v365_v44 = vstv %s1090_s0  ;;  %s74_s5 = sld [smem:[#allocation2]] }
  0x49   :  { %v357_v45 = vstv %s1089_s26  ;;  %v366_v46 = vmul.f32 %v365_v44, %v1344_v10  ;;  %s1059_s6 = sld [smem:[#allocation2 + $0x3]] }
  0x4a   :  { %v358_v47 = vmul.f32 %v357_v45, %v1344_v10  ;;  %v438_v48 = vstv %s1097_s27  ;;  %s1062_s7 = sld [smem:[#allocation2 + $0x6]] }
  0x4b   :  { %219 = vrot.lane.b32.xlu0 %v217_v26, %s1286_s13  ;;  %v377_v49 = vstv %s1092_s28  ;;  %v439_v50 = vmul.f32 %v438_v48, %v1334_v0  ;;  %s1068_s8 = sld [smem:[#allocation2 + $0x80]] }
  0x4c   :  { %227 = vrot.lane.b32.xlu1 %v225_v27, %s1287_s16  ;;  %v378_v51 = vmul.f32 %v377_v49, %v1350_v15  ;;  %v446_v52 = vstv %s1098_s29  ;;  %s1065_s9 = sld [smem:[#allocation2 + $0x9]] }
  0x4d   :  { %v559_v53 = vstv %s1111_s30  ;;  %v447_v54 = vmul.f32 %v446_v52, %v1334_v0  ;;  %s1071_s10 = sld [smem:[#allocation2 + $0x83]] }
  0x4e   :  { %v560_v55 = vmul.f32 %v559_v53, %v1334_v0  ;;  %v75_v56 = vstv %s74_s5  ;;  %s1074_s11 = sld [smem:[#allocation2 + $0x86]] }
  0x4f   :  { %239 = vrot.lane.b32.xlu0 %v237_v30, %s1286_s13  ;;  %v76_v57 = vmul.f32 %v75_v56, %v1334_v0  ;;  %v94_v59 = vstv %s1059_s6  ;;  %s1077_s3 = sld [smem:[#allocation2 + $0x89]] }
  0x50   :  { %247 = vrot.lane.b32.xlu1 %v245_v31, %s1287_s16  ;;  %v95_v62 = vmul.f32 %v94_v59, %v1336_v1  ;;  %v114_v4 = vstv %s1062_s7  ;;  %s1082_s12 = sld [smem:[#allocation2 + $0x100]] }
  0x51   :  { %v115_v8 = vmul.f32 %v114_v4, %v1344_v10  ;;  %v193_v11 = vstv %s1068_s8  ;;  %s1085_s14 = sld [smem:[#allocation2 + $0x103]] }
  0x52   :  { %v134_v13 = vstv %s1065_s9  ;;  %v194_v18 = vmul.f32 %v193_v11, %v1334_v0  ;;  %s1088_s15 = sld [smem:[#allocation2 + $0x106]] }
  0x53   :  { %259 = vrot.lane.b32.xlu0 %v257_v34, %s1286_s13  ;;  %v212_v19 = vstv %s1071_s10  ;;  %v135_v21 = vmul.f32 %v134_v13, %v1350_v15  ;;  %s1096_s17 = sld [smem:[#allocation2 + $0x180]] }
  0x54   :  { %267 = vrot.lane.b32.xlu1 %v265_v35, %s1287_s16  ;;  %v213_v26 = vmul.f32 %v212_v19, %v1336_v1  ;;  %v232_v30 = vstv %s1074_s11  ;;  %s1091_s18 = sld [smem:[#allocation2 + $0x109]] }
  0x55   :  { %v233_v36 = vmul.f32 %v232_v30, %v1344_v10  ;;  %s1125_s19 = sld [smem:[#allocation2 + $0x281]] }
  0x56   :  { %v314_v45 = vstv %s1082_s12  ;;  %s1112_s20 = sld [smem:[#allocation2 + $0x202]] }
  0x57   :  { %328 = vrot.lane.b32.xlu0 %v326_v38, %s1287_s16  ;;  %v333_v52 = vstv %s1085_s14  ;;  %s1139_s21 = sld [smem:[#allocation2 + $0x301]] }
  0x58   :  { %320 = vrot.lane.b32.xlu1 %v318_v39, %s1286_s13  ;;  %s1126_s22 = sld [smem:[#allocation2 + $0x282]] }
  0x59   :  { %s1153_s23 = sld [smem:[#allocation2 + $0x381]] }
  0x5a   :  { %s1140_s24 = sld [smem:[#allocation2 + $0x302]] }
  0x5b   :  { %348 = vrot.lane.b32.xlu0 %v346_v42, %s1287_s16  ;;  %v252_v42 = vstv %s1077_s3  ;;  %s1100_s25 = sld [smem:[#allocation2 + $0x184]] }
  0x5c   :  { %340 = vrot.lane.b32.xlu1 %v338_v43, %s1286_s13  ;;  %v253_v48 = vmul.f32 %v252_v42, %v1350_v15  ;;  %s1154_s1 = sld [smem:[#allocation2 + $0x382]] }
  0x5d   :  { %v801_v30 = vstv %s1139_s21  ;;  %s1114_s0 = sld [smem:[#allocation2 + $0x204]] }
  0x5e   :  { %s1101_s26 = sld [smem:[#allocation2 + $0x185]] }
  0x5f   :  { %368 = vrot.lane.b32.xlu0 %v366_v46, %s1287_s16  ;;  %s1128_s27 = sld [smem:[#allocation2 + $0x284]] }
  0x60   :  { %360 = vrot.lane.b32.xlu1 %v358_v47, %s1286_s13  ;;  %s1115_s28 = sld [smem:[#allocation2 + $0x205]] }
  0x61   :  { %s1142_s29 = sld [smem:[#allocation2 + $0x304]] }
  0x62   :  { %s1129_s30 = sld [smem:[#allocation2 + $0x285]] }
  0x63   :  { %441 = vrot.lane.b32.xlu0 %v439_v50, %s1286_s13  ;;  %v315_v50 = vmul.f32 %v314_v45, %v1334_v0  ;;  %s1156_s5 = sld [smem:[#allocation2 + $0x384]] }
  0x64   :  { %380 = vrot.lane.b32.xlu1 %v378_v51, %s1286_s13  ;;  %v466_v45 = vstv %s1101_s26  ;;  %s1143_s6 = sld [smem:[#allocation2 + $0x305]] }
  0x65   :  { %s1103_s7 = sld [smem:[#allocation2 + $0x187]] }
  0x66   :  { %s1157_s8 = sld [smem:[#allocation2 + $0x385]] }
  0x67   :  { %449 = vrot.lane.b32.xlu0 %v447_v54, %s1287_s16  ;;  %s1117_s9 = sld [smem:[#allocation2 + $0x207]] }
  0x68   :  { %562 = vrot.lane.b32.xlu1 %v560_v55, %s1286_s13  ;;  %s1104_s10 = sld [smem:[#allocation2 + $0x188]] }
  0x69   :  { %s1131_s11 = sld [smem:[#allocation2 + $0x287]] }
  0x6a   :  { %s1118_s3 = sld [smem:[#allocation2 + $0x208]] }
  0x6b   :  { %s1145_s12 = sld [smem:[#allocation2 + $0x307]] }
  0x6c   :  { %s1132_s14 = sld [smem:[#allocation2 + $0x288]] }
  0x6d   :  { %s1120_s21 = sld [smem:[#allocation2 + $0x20a]] }
  0x6e   :  { %s1149_s26 = sld [smem:[#allocation2 + $0x30b]] }
  0xa9   :  { %v82_v58 = vpop.permute.xlu0 %81 }
  0xaa   :  { %v102_v60 = vpop.permute.xlu1 %101  ;;  %v84_v61 = vadd.f32 %v82_v58, %v76_v57  ;;  %v334_v57 = vmul.f32 %v333_v52, %v1336_v1 }
  0xad   :  { %v90_v63 = vpop.permute.xlu0 %89 }
  0xae   :  { %v92_v2 = vadd.f32 %v90_v63, %v84_v61  ;;  %v110_v3 = vpop.permute.xlu1 %109  ;;  %v353_v63 = vstv %s1088_s15  ;;  %s1159_s15 = sld [smem:[#allocation2 + $0x387]] }
  0xb0   :  { %v96_v5 = vadd.f32 %v95_v62, %v92_v2 }
  0xb1   :  { %v122_v6 = vpop.permute.xlu0 %121 }
  0xb2   :  { %v104_v7 = vadd.f32 %v102_v60, %v96_v5  ;;  %v130_v9 = vpop.permute.xlu1 %129 }
  0xb4   :  { %v112_v12 = vadd.f32 %v110_v3, %v104_v7  ;;  %v435_v3 = vstv %s1096_s17  ;;  %v354_v7 = vmul.f32 %v353_v63, %v1344_v10  ;;  %s1146_s17 = sld [smem:[#allocation2 + $0x308]] }
  0xb5   :  { %v142_v14 = vpop.permute.xlu0 %141  ;;  %v436_v11 = vmul.f32 %v435_v3, %v1334_v0 }
  0xb6   :  { %v116_v16 = vadd.f32 %v115_v8, %v112_v12  ;;  %v150_v17 = vpop.permute.xlu1 %149 }
  0xb8   :  { %v124_v20 = vadd.f32 %v122_v6, %v116_v16 }
  0xb9   :  { %v200_v22 = vpop.permute.xlu0 %199 }
  0xba   :  { %v132_v23 = vadd.f32 %v130_v9, %v124_v20  ;;  %v202_v24 = vadd.f32 %v200_v22, %v194_v18  ;;  %v208_v25 = vpop.permute.xlu1 %207 }
  0xbc   :  { %v136_v27 = vadd.f32 %v135_v21, %v132_v23  ;;  %v210_v28 = vadd.f32 %v208_v25, %v202_v24 }
  0xbd   :  { %v220_v29 = vpop.permute.xlu0 %219 }
  0xbe   :  { %v144_v31 = vadd.f32 %v142_v14, %v136_v27  ;;  %v214_v32 = vadd.f32 %v213_v26, %v210_v28  ;;  %v228_v33 = vpop.permute.xlu1 %227  ;;  %v373_v14 = vstv %s1091_s18  ;;  %v680_v26 = vstv %s1125_s19  ;;  %s1106_s18 = sld [smem:[#allocation2 + $0x18a]] }
  0xbf   :  { %v374_v20 = vmul.f32 %v373_v14, %v1350_v15  ;;  %v567_v28 = vstv %s1112_s20  ;;  %s1160_s19 = sld [smem:[#allocation2 + $0x388]] }
  0xc0   :  { %v1400_v34 = vadd.f32 %v150_v17, %v144_v31  ;;  %v222_v35 = vadd.f32 %v220_v29, %v214_v32  ;;  %v681_v29 = vmul.f32 %v680_v26, %v1334_v0  ;;  %v568_v31 = vmul.f32 %v567_v28, %v1334_v0  ;;  %s1093_s20 = sld [smem:[#allocation2 + $0x10b]] }
  0xc1   :  { %v240_v37 = vpop.permute.xlu0 %239  ;;  %v688_v32 = vstv %s1126_s22  ;;  %s1107_s22 = sld [smem:[#allocation2 + $0x18b]]  ;;  %v619_v28 = vstv %s1120_s21 }
  0xc2   :  { %v230_v38 = vadd.f32 %v228_v33, %v222_v35  ;;  %v154_v39 = vsel %vm153_vm0, %v1400_v34, 0.0  ;;  %v165_v40 = vmul.f32 %v1400_v34, %v1400_v34  ;;  %v248_v41 = vpop.permute.xlu1 %247  ;;  %v802_v33 = vmul.f32 %v801_v30, %v1334_v0  ;;  %s1621_s21 = sld [smem:[#allocation2 + $0x389]] }
  0xc3   :  { %155 = vadd.xlane.f32.xlu0 %v154_v39  ;;  %v922_v35 = vstv %s1153_s23  ;;  %v458_v39 = vstv %s1100_s25  ;;  %s1134_s23 = sld [smem:[#allocation2 + $0x28a]] }
  0xc4   :  { %v234_v43 = vadd.f32 %v233_v36, %v230_v38  ;;  %v166_v44 = vsel %vm153_vm0, %v165_v40, 0.0  ;;  %v689_v36 = vmul.f32 %v688_v32, %v1334_v0  ;;  %v923_v38 = vmul.f32 %v922_v35, %v1334_v0  ;;  %s1148_s25 = sld [smem:[#allocation2 + $0x30a]] }
  0xc5   :  { %167 = vadd.xlane.f32.xlu1 %v166_v44  ;;  %v260_v46 = vpop.permute.xlu0 %259  ;;  %v459_v42 = vmul.f32 %v458_v39, %v1336_v1 }
  0xc6   :  { %v242_v47 = vadd.f32 %v240_v37, %v234_v43  ;;  %v268_v49 = vpop.permute.xlu1 %267  ;;  %v809_v37 = vstv %s1140_s24  ;;  %v579_v43 = vstv %s1114_s0  ;;  %s1121_s24 = sld [smem:[#allocation2 + $0x20b]] }
  0xc7   :  { %v810_v40 = vmul.f32 %v809_v37, %v1334_v0  ;;  %v506_v30 = vstv %s1107_s22  ;;  %s1162_s0 = sld [smem:[#allocation2 + $0x38a]] }
  0xc8   :  { %v250_v51 = vadd.f32 %v248_v41, %v242_v47  ;;  %v930_v41 = vstv %s1154_s1  ;;  %v700_v47 = vstv %s1128_s27  ;;  %s1135_s1 = sld [smem:[#allocation2 + $0x28b]] }
  0xc9   :  { %v329_v53 = vpop.permute.xlu0 %328  ;;  %v931_v44 = vmul.f32 %v930_v41, %v1334_v0  ;;  %v740_v32 = vstv %s1134_s23  ;;  %s1163_s27 = sld [smem:[#allocation2 + $0x38b]] }
  0xca   :  { %v254_v54 = vadd.f32 %v253_v48, %v250_v51  ;;  %v321_v55 = vpop.permute.xlu1 %320  ;;  %v467_v48 = vmul.f32 %v466_v45, %v1336_v1  ;;  %v821_v51 = vstv %s1142_s29  ;;  %v861_v37 = vstv %s1148_s25  ;;  %s1099_s29 = sld [smem:[#allocation2 + $0x183]] }
  0xcb   :  { %v323_v56 = vadd.f32 %v321_v55, %v315_v50  ;;  %v701_v50 = vmul.f32 %v700_v47, %v1336_v1  ;;  %v942_v55 = vstv %s1156_s5  ;;  %s1113_s5 = sld [smem:[#allocation2 + $0x203]] }
  0xcc   :  { %v262_v58 = vadd.f32 %v260_v46, %v254_v54  ;;  %v580_v46 = vmul.f32 %v579_v43, %v1336_v1  ;;  %v822_v54 = vmul.f32 %v821_v51, %v1336_v1  ;;  %v627_v35 = vstv %s1121_s24  ;;  %s1080_s22 = sld [smem:[#allocation7 + $0x1]]  ;;  %s1288_s24 = smov 16  }
  0xcd   :  { %v331_v59 = vadd.f32 %v329_v53, %v323_v56  ;;  %v349_v60 = vpop.permute.xlu0 %348  ;;  %v708_v53 = vstv %s1129_s30  ;;  %v982_v41 = vstv %s1162_s0  ;;  %v869_v43 = vstv %s1149_s26  ;;  %s1124_s30 = sld [smem:[#allocation2 + $0x280]] }
  0xce   :  { %v1411_v61 = vadd.f32 %v268_v49, %v262_v58  ;;  %v341_v62 = vpop.permute.xlu1 %340  ;;  %v587_v49 = vstv %s1115_s28  ;;  %v709_v56 = vmul.f32 %v708_v53, %v1336_v1  ;;  %v943_v58 = vmul.f32 %v942_v55, %v1336_v1  ;;  %s1110_s28 = sld [smem:[#allocation2 + $0x200]] }
  0xcf   :  { %v335_v2 = vadd.f32 %v334_v57, %v331_v59  ;;  %v588_v52 = vmul.f32 %v587_v49, %v1336_v1  ;;  %v829_v57 = vstv %s1143_s6  ;;  %v478_v59 = vstv %s1103_s7  ;;  %s1138_s6 = sld [smem:[#allocation2 + $0x300]] }
  0xd0   :  { %v271_v4 = vsel %vm153_vm0, %v1411_v61, 0.0  ;;  %v281_v5 = vmul.f32 %v1411_v61, %v1411_v61  ;;  %v479_v63 = vmul.f32 %v478_v59, %v1344_v10  ;;  %v748_v39 = vstv %s1135_s1  ;;  %s1152_s7 = sld [smem:[#allocation2 + $0x380]] }
  0xd1   :  { %272 = vadd.xlane.f32.xlu0 %v271_v4  ;;  %v343_v6 = vadd.f32 %v341_v62, %v335_v2  ;;  %v369_v8 = vpop.permute.xlu0 %368  ;;  %v950_v62 = vstv %s1157_s8  ;;  %v599_v2 = vstv %s1117_s9  ;;  %v486_v4 = vstv %s1104_s10  ;;  %s1533_s8 = sld [smem:[#allocation2 + $0x283]] }
  0xd2   :  { %v282_v9 = vsel %vm153_vm0, %v281_v5, 0.0  ;;  %v361_v13 = vpop.permute.xlu1 %360  ;;  %v951_v3 = vmul.f32 %v950_v62, %v1336_v1  ;;  %v600_v5 = vmul.f32 %v599_v2, %v1344_v10  ;;  %v990_v45 = vstv %s1163_s27  ;;  %s1539_s9 = sld [smem:[#allocation2 + $0x186]] }
  0xd3   :  { %283 = vadd.xlane.f32.xlu1 %v282_v9  ;;  %v351_v12 = vadd.f32 %v349_v60, %v343_v6  ;;  %v830_v60 = vmul.f32 %v829_v57, %v1336_v1  ;;  %v720_v6 = vstv %s1131_s11  ;;  %v991_v47 = vmul.f32 %v990_v45, %v1350_v15  ;;  %s1545_s10 = sld [smem:[#allocation2 + $0x303]] }
  0xd4   :  { %v721_v9 = vmul.f32 %v720_v6, %v1344_v10  ;;  %s1547_s11 = sld [smem:[#allocation2 + $0x383]] }
  0xd5   :  { %v355_v16 = vadd.f32 %v354_v7, %v351_v12  ;;  %v442_v17 = vpop.permute.xlu0 %441  ;;  %v487_v7 = vmul.f32 %v486_v4, %v1344_v10  ;;  %s1081_s23 = sld [smem:[#allocation8 + $0x1]] }
  0xd6   :  { %v444_v18 = vadd.f32 %v442_v17, %v436_v11  ;;  %v381_v23 = vpop.permute.xlu1 %380  ;;  %v841_v11 = vstv %s1145_s12  ;;  %s1564_s12 = sld [smem:[#allocation2 + $0x286]] }
  0xd7   :  { %v363_v19 = vadd.f32 %v361_v13, %v355_v16  ;;  %v728_v13 = vstv %s1132_s14  ;;  %v842_v14 = vmul.f32 %v841_v11, %v1344_v10  ;;  %v962_v16 = vstv %s1159_s15  ;;  %s1572_s14 = sld [smem:[#allocation2 + $0x306]] }
  0xd8   :  { %v729_v17 = vmul.f32 %v728_v13, %v1344_v10  ;;  %s1579_s15 = sld [smem:[#allocation2 + $0x189]] }
  0xd9   :  { %v371_v21 = vadd.f32 %v369_v8, %v363_v19  ;;  %v450_v22 = vpop.permute.xlu0 %449  ;;  %v607_v8 = vstv %s1118_s3  ;;  %v963_v19 = vmul.f32 %v962_v16, %v1344_v10  ;;  %s1552_s3 = sld [smem:[#allocation2 + $0x206]] }
  0xda   :  { %v1421_v24 = vadd.f32 %v450_v22, %v444_v18  ;;  %v608_v12 = vmul.f32 %v607_v8, %v1344_v10  ;;  %v849_v18 = vstv %s1146_s17  ;;  %v970_v22 = vstv %s1160_s19  ;;  %s1585_s17 = sld [smem:[#allocation2 + $0x386]] }
  0xdb   :  { %v375_v25 = vadd.f32 %v374_v20, %v371_v21  ;;  %v498_v20 = vstv %s1106_s18  ;;  %v850_v21 = vmul.f32 %v849_v18, %v1344_v10  ;;  %v971_v26 = vmul.f32 %v970_v22, %v1344_v10  ;;  %s1589_s18 = sld [smem:[#allocation2 + $0x209]] }
  0xdc   :  { %s1601_s19 = sld [smem:[#allocation2 + $0x289]] }
  0xdd   :  { %v1423_v27 = vadd.f32 %v381_v23, %v375_v25  ;;  %v499_v23 = vmul.f32 %v498_v20, %v1350_v15  ;;  %v385_v25 = vstv %s1093_s20  ;;  %s1616_s20 = sld [smem:[#allocation2 + $0x309]] }
  0xde   :  { %s1706_s25 = sld [smem:[#allocation7 + $0x2]] }
  0xdf   :  { %s1710_s1 = sld [smem:[#allocation8 + $0x2]] }
  0xe0   :  { %s1714_s0 = sld [smem:[#allocation7 + $0x3]] }
  0xe1   :  { %s1721_s26 = sld [smem:[#allocation8 + $0x3]] }
  0xe2   :  { %s1725_s27 = sld [smem:[#allocation7 + $0x4]] }
  0xe4   :  { %683 = vrot.lane.b32.xlu1 %v681_v29, %s1286_s13  ;;  %v386_v29 = vmul.f32 %v385_v25, %v1350_v15 }
  0xe7   :  { %570 = vrot.lane.b32.xlu0 %v568_v31, %s1287_s16  ;;  %v620_v31 = vmul.f32 %v619_v28, %v1350_v15 }
  0xe8   :  { %804 = vrot.lane.b32.xlu1 %v802_v33, %s1286_s13  ;;  %v507_v33 = vmul.f32 %v506_v30, %v1350_v15 }
  0xeb   :  { %691 = vrot.lane.b32.xlu0 %v689_v36, %s1287_s16  ;;  %v741_v36 = vmul.f32 %v740_v32, %v1350_v15 }
  0xec   :  { %925 = vrot.lane.b32.xlu1 %v923_v38, %s1286_s13  ;;  %v628_v38 = vmul.f32 %v627_v35, %v1350_v15 }
  0xef   :  { %812 = vrot.lane.b32.xlu0 %v810_v40, %s1287_s16  ;;  %v862_v40 = vmul.f32 %v861_v37, %v1350_v15 }
  0xf0   :  { %461 = vrot.lane.b32.xlu1 %v459_v42, %s1286_s13  ;;  %v749_v42 = vmul.f32 %v748_v39, %v1350_v15  ;;  %v556_v39 = vstv %s1110_s28  ;;  %s1164_s28 = sld [smem:[#allocation7 + $0x7]] }
  0xf3   :  { %933 = vrot.lane.b32.xlu0 %v931_v44, %s1287_s16  ;;  %v983_v44 = vmul.f32 %v982_v41, %v1350_v15  ;;  %v454_v41 = vstv %s1099_s29  ;;  %s1137_s29 = sld [smem:[#allocation8 + $0x5]] }
  0xf4   :  { %582 = vrot.lane.b32.xlu1 %v580_v46, %s1286_s13  ;;  %v870_v46 = vmul.f32 %v869_v43, %v1350_v15  ;;  %v557_v43 = vmul.f32 %v556_v39, %v1334_v0 }
  0xf7   :  { %469 = vrot.lane.b32.xlu0 %v467_v48, %s1287_s16  ;;  %v1501_v48 = vpop.permute.xlu1 %562 }
  0xf8   :  { %703 = vrot.lane.b32.xlu1 %v701_v50, %s1286_s13 }
  0xfb   :  { %590 = vrot.lane.b32.xlu0 %v588_v52, %s1287_s16 }
  0xfc   :  { %824 = vrot.lane.b32.xlu1 %v822_v54, %s1286_s13 }
  0xff   :  { %711 = vrot.lane.b32.xlu0 %v709_v56, %s1287_s16 }
 0x100   :  { %945 = vrot.lane.b32.xlu1 %v943_v58, %s1286_s13 }
 0x103   :  { %832 = vrot.lane.b32.xlu0 %v830_v60, %s1287_s16 }
 0x104   :  { %481 = vrot.lane.b32.xlu1 %v479_v63, %s1286_s13 }
 0x107   :  { %953 = vrot.lane.b32.xlu0 %v951_v3, %s1287_s16 }
 0x108   :  { %602 = vrot.lane.b32.xlu1 %v600_v5, %s1286_s13 }
 0x10b   :  { %489 = vrot.lane.b32.xlu0 %v487_v7, %s1287_s16 }
 0x10c   :  { %723 = vrot.lane.b32.xlu1 %v721_v9, %s1286_s13 }
 0x10f   :  { %610 = vrot.lane.b32.xlu0 %v608_v12, %s1287_s16 }
 0x110   :  { %844 = vrot.lane.b32.xlu1 %v842_v14, %s1286_s13 }
 0x113   :  { %731 = vrot.lane.b32.xlu0 %v729_v17, %s1287_s16 }
 0x114   :  { %965 = vrot.lane.b32.xlu1 %v963_v19, %s1286_s13 }
 0x117   :  { %852 = vrot.lane.b32.xlu0 %v850_v21, %s1287_s16 }
 0x118   :  { %501 = vrot.lane.b32.xlu1 %v499_v23, %s1286_s13 }
 0x11b   :  { %973 = vrot.lane.b32.xlu0 %v971_v26, %s1287_s16 }
 0x11c   :  { %388 = vrot.lane.b32.xlu1 %v386_v29, %s1287_s16 }
 0x11f   :  { %622 = vrot.lane.b32.xlu0 %v620_v31, %s1286_s13 }
 0x120   :  { %509 = vrot.lane.b32.xlu1 %v507_v33, %s1287_s16 }
 0x123   :  { %743 = vrot.lane.b32.xlu0 %v741_v36, %s1286_s13 }
 0x124   :  { %630 = vrot.lane.b32.xlu1 %v628_v38, %s1287_s16 }
 0x127   :  { %864 = vrot.lane.b32.xlu0 %v862_v40, %s1286_s13 }
 0x128   :  { %751 = vrot.lane.b32.xlu1 %v749_v42, %s1287_s16  ;;  %v677_v42 = vstv %s1124_s30  ;;  %s1150_s30 = sld [smem:[#allocation7 + $0x6]] }
 0x12b   :  { %985 = vrot.lane.b32.xlu0 %v983_v44, %s1286_s13  ;;  %s182_s13 = sld [smem:[#allocation7]]  ;;  %v455_v44 = vmul.f32 %v454_v41, %v1336_v1 }
 0x12c   :  { %872 = vrot.lane.b32.xlu1 %v870_v46, %s1287_s16 }
 0x12f   :  { %993 = vrot.lane.b32.xlu0 %v991_v47, %s1287_s16  ;;  %s185_s16 = sld [smem:[#allocation8]]  ;;  %v678_v47 = vmul.f32 %v677_v42, %v1334_v0 }
 0x131   :  { %v183_v21 = vstv %s182_s13  ;;  %s1123_s13 = sld [smem:[#allocation8 + $0x4]] }
 0x135   :  { %v187_v28 = vstv %s185_s16  ;;  %s1136_s16 = sld [smem:[#allocation7 + $0x5]] }
 0x14c   :  { %v156_v49 = vpop.xlane.xlu0 %155 }
 0x14d   :  { %v158_v50 = vsel %vm157_vm1, %v156_v49, 0.0  ;;  %v575_v49 = vstv %s1113_s5  ;;  %s1165_s5 = sld [smem:[#allocation8 + $0x7]] }
 0x14e   :  { %v159_v51 = vrot.slane %v158_v50, 4  ;;  %v168_v52 = vpop.xlane.xlu1 %167 }
 0x14f   :  { %v169_v53 = vsel %vm157_vm1, %v168_v52, 0.0  ;;  %v565_v52 = vadd.f32 %v1501_v48, %v557_v43 }
 0x150   :  { %v160_v54 = vadd.f32 %v159_v51, %v158_v50  ;;  %v170_v55 = vrot.slane %v169_v53, 4  ;;  %v798_v50 = vstv %s1138_s6  ;;  %s1289_s6 = smov 48  }
 0x152   :  { %v161_v56 = vrot.slane %v160_v54, 2  ;;  %v171_v57 = vadd.f32 %v170_v55, %v169_v53  ;;  %v919_v53 = vstv %s1152_s7  ;;  %v456_v55 = vadd.f32 %v455_v44, %v1421_v24  ;;  %s1151_s7 = sld [smem:[#allocation8 + $0x6]] }
 0x153   :  { %v920_v48 = vmul.f32 %v919_v53, %v1334_v0 }
 0x154   :  { %v162_v58 = vadd.f32 %v161_v56, %v160_v54  ;;  %v172_v59 = vrot.slane %v171_v57, 2  ;;  %v576_v56 = vmul.f32 %v575_v49, %v1336_v1 }
 0x156   :  { %v163_v60 = vrot.slane %v162_v58, 1  ;;  %v173_v62 = vadd.f32 %v172_v59, %v171_v57 }
 0x158   :  { %v164_v63 = vadd.f32 %v163_v60, %v162_v58  ;;  %v174_v2 = vrot.slane %v173_v62, 1 }
 0x15a   :  { %v176_v3 = vmul.f32 0.03125, %v164_v63  ;;  %v175_v4 = vadd.f32 %v174_v2, %v173_v62  ;;  %v273_v5 = vpop.xlane.xlu0 %272  ;;  %v799_v62 = vmul.f32 %v798_v50, %v1334_v0  ;;  %v696_v63 = vstv %s1533_s8  ;;  %s1291_s8 = smov 80  }
 0x15b   :  { %v274_v46 = vsel %vm157_vm1, %v273_v5, 0.0  ;;  %v474_v5 = vstv %s1539_s9  ;;  %v697_v0 = vmul.f32 %v696_v63, %v1336_v1  ;;  %s1292_s9 = smov 112  }
 0x15c   :  { %v178_v6 = vmul.f32 %v176_v3, %v176_v3  ;;  %v177_v7 = vmul.f32 0.03125, %v175_v4  ;;  %v284_v8 = vpop.xlane.xlu1 %283  ;;  %v275_v54 = vrot.slane %v274_v46, 4 }
 0x15d   :  { %v285_v58 = vsel %vm157_vm1, %v284_v8, 0.0 }
 0x15e   :  { %v179_v9 = vsub.f32 %v177_v7, %v178_v6  ;;  %v571_v11 = vpop.permute.xlu0 %570  ;;  %v276_v24 = vadd.f32 %v275_v54, %v274_v46  ;;  %v286_v4 = vrot.slane %v285_v58, 4 }
 0x15f   :  { %v573_v59 = vadd.f32 %v571_v11, %v565_v52  ;;  %v837_v52 = vstv %s1572_s14 }
 0x160   :  { %v180_v12 = vadd.f32 1e-05, %v179_v9  ;;  %v684_v13 = vpop.permute.xlu1 %683 }
 0x161   :  { %v686_v60 = vadd.f32 %v684_v13, %v678_v47  ;;  %v577_v9 = vadd.f32 %v576_v56, %v573_v59  ;;  %v938_v13 = vstv %s1547_s11  ;;  %v958_v56 = vstv %s1585_s17  ;;  %s1294_s11 = smov [#allocation11]  }
 0x162   :  { %1181 = vrsqrt.f32 %v180_v12  ;;  %v1505_v14 = vpop.permute.xlu0 %691  ;;  %v817_v12 = vstv %s1545_s10  ;;  %s1293_s10 = smov 96  }
 0x163   :  { %v694_v7 = vadd.f32 %v1505_v14, %v686_v60  ;;  %v475_v14 = vmul.f32 %v474_v5, %v1344_v10  ;;  %v959_v5 = vmul.f32 %v958_v56, %v1344_v10 }
 0x164   :  { %v1507_v16 = vpop.permute.xlu1 %804 }
 0x165   :  { %v807_v8 = vadd.f32 %v1507_v16, %v799_v62  ;;  %v595_v16 = vstv %s1552_s3  ;;  %s1045_s3 = sshll.u32 %s1294_s11, 4  ;;  %s1046_s3 = int_to_ptr.vmem [resolvable:$true] %s1045_s3 }
 0x166   :  { %v1509_v17 = vpop.permute.xlu0 %812  ;;  %p1255_p2 = scmp.lt.s32.totalorder %s1046_s3, %s1046_s3 }
 0x168   :  { %v1511_v18 = vpop.permute.xlu1 %925 }
 0x169   :  { %v928_v11 = vadd.f32 %v1511_v18, %v920_v48  ;;  %v815_v18 = vadd.f32 %v1509_v17, %v807_v8  ;;  %v716_v17 = vstv %s1564_s12  ;;  %v615_v48 = vstv %s1589_s18  ;;  %s1250_s12 = scalar_lea.vmem %s1046_s3, 32 }
 0x16a   :  { %v1513_v19 = vpop.permute.xlu0 %933  ;;  %v717_v50 = vmul.f32 %v716_v17, %v1344_v10  ;;  %p1251_p1 = scmp.ne.s32.totalorder %s1046_s3, %s1250_s12  ;;  %p1256_p3 = scmp.lt.s32.totalorder %s1250_s12, %s1250_s12 }
 0x16c   :  { %v462_v20 = vpop.permute.xlu1 %461  ;;  %p1257_p4 = por %p1256_p3, %p1255_p2 }
 0x16e   :  { %v1515_v22 = vpop.permute.xlu0 %469  ;;  %p1258_p5 = pnand %p1257_p4, %p1251_p1 }
 0x16f   :  { %v1182_v23 = vpop.eup %1181 }
 0x170   :  { %v1517_v25 = vpop.permute.xlu1 %582  ;;  %v184_v26 = vmul.f32 %v1182_v23, %v183_v21 }
 0x171   :  { %v585_v23 = vadd.f32 %v1517_v25, %v577_v9  ;;  %v939_v25 = vmul.f32 %v938_v13, %v1336_v1  ;;  %v736_v9 = vstv %s1601_s19 }
 0x172   :  { %v1519_v29 = vpop.permute.xlu0 %590  ;;  %v186_v30 = vmul.f32 %v184_v26, %v176_v3  ;;  %v189_v33 = vmul.f32 %v184_v26, %v1400_v34  ;;  %v464_v3 = vadd.f32 %v462_v20, %v456_v55  ;;  %v277_v26 = vrot.slane %v276_v24, 2 }
 0x173   :  { %v593_v41 = vadd.f32 %v1519_v29, %v585_v23  ;;  %v494_v29 = vstv %s1579_s15 }
 0x174   :  { %v1521_v31 = vpop.permute.xlu1 %703  ;;  %v188_v32 = vsub.f32 %v187_v28, %v186_v30  ;;  %v472_v21 = vadd.f32 %v1515_v22, %v464_v3  ;;  %v287_v28 = vadd.f32 %v286_v4, %v285_v58  ;;  %v936_v22 = vadd.f32 %v1513_v19, %v928_v11 }
 0x175   :  { %v278_v44 = vadd.f32 %v277_v26, %v276_v24  ;;  %v495_v3 = vmul.f32 %v494_v29, %v1350_v15  ;;  %v838_v24 = vmul.f32 %v837_v52, %v1344_v10 }
 0x176   :  { %v1524_v35 = vpop.permute.xlu0 %711  ;;  %v190_v36 = vadd.f32 %v189_v33, %v188_v32  ;;  %v698_v32 = vadd.f32 %v697_v0, %v694_v7  ;;  %v818_v33 = vmul.f32 %v817_v12, %v1336_v1  ;;  %v476_v43 = vadd.f32 %v475_v14, %v472_v21 }
 0x177   :  { %v288_v46 = vrot.slane %v287_v28, 2  ;;  %v940_v49 = vadd.f32 %v939_v25, %v936_v22  ;;  %v279_v58 = vrot.slane %v278_v44, 1 }
 0x178   :  { %v1526_v37 = vpop.permute.xlu1 %824  ;;  %191 = vst.msk [vmem:[#allocation11] sm:$0x3] %vm153_vm0, %v190_v36  ;;  %v596_v36 = vmul.f32 %v595_v16, %v1344_v10  ;;  %v706_v42 = vadd.f32 %v1521_v31, %v698_v32  ;;  %v819_v19 = vadd.f32 %v818_v33, %v815_v18  ;;  %v1197_v16 = vld [vmem:[#allocation10 + $0x6] sm:$0x3]  ;;  %v857_v33 = vstv %s1616_s20 }
 0x179   :  { %v289_v59 = vadd.f32 %v288_v46, %v287_v28  ;;  %v280_v7 = vadd.f32 %v279_v58, %v278_v44  ;;  %v858_v46 = vmul.f32 %v1197_v16, %v857_v33 }
 0x17a   :  { %v1529_v38 = vpop.permute.xlu0 %832  ;;  %v714_v31 = vadd.f32 %v1524_v35, %v706_v42  ;;  %v827_v54 = vadd.f32 %v1526_v37, %v819_v19  ;;  %v597_v55 = vadd.f32 %v596_v36, %v593_v41  ;;  %v978_v41 = vstv %s1621_s21 }
 0x17b   :  { %v1632_v23 = vmul.f32 0.03125, %v280_v7 }
 0x17c   :  { %v1531_v40 = vpop.permute.xlu1 %945  ;;  %v835_v37 = vadd.f32 %v1529_v38, %v827_v54  ;;  %v718_v4 = vadd.f32 %v717_v50, %v714_v31 }
 0x17d   :  { %v948_v60 = vadd.f32 %v1531_v40, %v940_v49  ;;  %v616_v40 = vmul.f32 %v615_v48, %v1350_v15 }
 0x17e   :  { %v1535_v34 = vpop.permute.xlu0 %953  ;;  %v839_v10 = vadd.f32 %v838_v24, %v835_v37 }
 0x180   :  { %v1541_v45 = vpop.permute.xlu1 %481 }
 0x181   :  { %v484_v1 = vadd.f32 %v1541_v45, %v476_v43  ;;  %v294_v43 = vmul.f32 %v1632_v23, %v1632_v23 }
 0x182   :  { %v1549_v51 = vpop.permute.xlu0 %489 }
 0x183   :  { %v492_v45 = vadd.f32 %v1549_v51, %v484_v1  ;;  %v290_v51 = vrot.slane %v289_v59, 1  ;;  %v979_v1 = vmul.f32 %v1197_v16, %v978_v41 }
 0x184   :  { %v1556_v57 = vpop.permute.xlu1 %602 }
 0x185   :  { %v605_v63 = vadd.f32 %v1556_v57, %v597_v55  ;;  %v956_v57 = vadd.f32 %v1535_v34, %v948_v60  ;;  %v496_v12 = vadd.f32 %v495_v3, %v492_v45  ;;  %v291_v34 = vadd.f32 %v290_v51, %v289_v59 }
 0x186   :  { %v1562_v2 = vpop.permute.xlu0 %610 }
 0x187   :  { %v613_v0 = vadd.f32 %v1562_v2, %v605_v63  ;;  %v960_v14 = vadd.f32 %v959_v5, %v956_v57  ;;  %v737_v2 = vmul.f32 %v1197_v16, %v736_v9 }
 0x188   :  { %v1567_v6 = vpop.permute.xlu1 %723 }
 0x189   :  { %v726_v11 = vadd.f32 %v1567_v6, %v718_v4  ;;  %v617_v28 = vadd.f32 %v616_v40, %v613_v0 }
 0x18a   :  { %v1577_v20 = vpop.permute.xlu0 %731 }
 0x18b   :  { %v734_v26 = vadd.f32 %v1577_v20, %v726_v11  ;;  %v293_v20 = vmul.f32 0.03125, %v291_v34  ;;  %v299_v11 = vstv %s1080_s22 }
 0x18c   :  { %v1587_v30 = vpop.permute.xlu1 %844 }
 0x18d   :  { %v738_v44 = vadd.f32 %v737_v2, %v734_v26  ;;  %v295_v54 = vsub.f32 %v293_v20, %v294_v43 }
 0x18e   :  { %v1596_v39 = vpop.permute.xlu0 %852 }
 0x18f   :  { %v296_v48 = vadd.f32 1e-05, %v295_v54 }
 0x190   :  { %v966_v47 = vpop.permute.xlu1 %965 }
 0x191   :  { %v968_v32 = vadd.f32 %v966_v47, %v960_v14  ;;  %1183 = vrsqrt.f32 %v296_v48 }
 0x192   :  { %v974_v53 = vpop.permute.xlu0 %973 }
 0x193   :  { %v976_v19 = vadd.f32 %v974_v53, %v968_v32 }
 0x194   :  { %v502_v62 = vpop.permute.xlu1 %501 }
 0x195   :  { %v504_v15 = vadd.f32 %v502_v62, %v496_v12  ;;  %v980_v58 = vadd.f32 %v979_v1, %v976_v19 }
 0x196   :  { %v623_v35 = vpop.permute.xlu0 %622 }
 0x197   :  { %v625_v25 = vadd.f32 %v623_v35, %v617_v28 }
 0x198   :  { %v389_v8 = vpop.permute.xlu1 %388 }
 0x199   :  { %v1628_v38 = vadd.f32 %v389_v8, %v1423_v27  ;;  %v847_v27 = vadd.f32 %v1587_v30, %v839_v10  ;;  %v303_v10 = vstv %s1081_s23 }
 0x19a   :  { %v744_v13 = vpop.permute.xlu0 %743 }
 0x19b   :  { %v392_v21 = vsel %vm153_vm0, %v1628_v38, 0.0  ;;  %v402_v42 = vmul.f32 %v1628_v38, %v1628_v38  ;;  %v855_v30 = vadd.f32 %v1596_v39, %v847_v27  ;;  %v746_v50 = vadd.f32 %v744_v13, %v738_v44 }
 0x19c   :  { %393 = vadd.xlane.f32.xlu1 %v392_v21  ;;  %v510_v6 = vpop.permute.xlu1 %509 }
 0x19d   :  { %v1636_v18 = vadd.f32 %v510_v6, %v504_v15  ;;  %v403_v52 = vsel %vm153_vm0, %v402_v42, 0.0  ;;  %v859_v39 = vadd.f32 %v858_v46, %v855_v30 }
 0x19e   :  { %v865_v22 = vpop.permute.xlu0 %864  ;;  %v1184_v0 = vpop.eup %1183 }
 0x19f   :  { %v513_v36 = vsel %vm153_vm0, %v1636_v18, 0.0  ;;  %v523_v31 = vmul.f32 %v1636_v18, %v1636_v18  ;;  %v867_v53 = vadd.f32 %v865_v22, %v859_v39  ;;  %v300_v12 = vmul.f32 %v1184_v0, %v299_v11 }
 0x1a0   :  { %v631_v17 = vpop.permute.xlu1 %630  ;;  %514 = vadd.xlane.f32.xlu0 %v513_v36 }
 0x1a1   :  { %v1647_v47 = vadd.f32 %v631_v17, %v625_v25  ;;  %v524_v59 = vsel %vm153_vm0, %v523_v31, 0.0  ;;  %v302_v13 = vmul.f32 %v300_v12, %v1632_v23  ;;  %v305_v21 = vmul.f32 %v300_v12, %v1411_v61 }
 0x1a2   :  { %v986_v49 = vpop.permute.xlu0 %985 }
 0x1a3   :  { %v634_v29 = vsel %vm153_vm0, %v1647_v47, 0.0  ;;  %v644_v62 = vmul.f32 %v1647_v47, %v1647_v47  ;;  %v988_v3 = vadd.f32 %v986_v49, %v980_v58  ;;  %v304_v15 = vsub.f32 %v303_v10, %v302_v13 }
 0x1a4   :  { %v752_v55 = vpop.permute.xlu1 %751  ;;  %404 = vadd.xlane.f32.xlu0 %v403_v52  ;;  %635 = vadd.xlane.f32.xlu1 %v634_v29 }
 0x1a5   :  { %v1654_v56 = vadd.f32 %v752_v55, %v746_v50  ;;  %v645_v37 = vsel %vm153_vm0, %v644_v62, 0.0  ;;  %v306_v34 = vadd.f32 %v305_v21, %v304_v15 }
 0x1a6   :  { %v994_v45 = vpop.permute.xlu0 %993 }
 0x1a7   :  { %v755_v60 = vsel %vm153_vm0, %v1654_v56, 0.0  ;;  %v1663_v35 = vadd.f32 %v994_v45, %v988_v3  ;;  %v765_v5 = vmul.f32 %v1654_v56, %v1654_v56 }
 0x1a8   :  { %v873_v63 = vpop.permute.xlu1 %872  ;;  %525 = vadd.xlane.f32.xlu0 %v524_v59  ;;  %756 = vadd.xlane.f32.xlu1 %v755_v60 }
 0x1a9   :  { %v1661_v24 = vadd.f32 %v873_v63, %v867_v53  ;;  %v766_v40 = vsel %vm153_vm0, %v765_v5, 0.0  ;;  %v997_v7 = vsel %vm153_vm0, %v1663_v35, 0.0  ;;  %v1007_v57 = vmul.f32 %v1663_v35, %v1663_v35 }
 0x1ab   :  { %v876_v4 = vsel %vm153_vm0, %v1661_v24, 0.0  ;;  %v886_v51 = vmul.f32 %v1661_v24, %v1661_v24  ;;  %v1008_v9 = vsel %vm153_vm0, %v1007_v57, 0.0 }
 0x1ac   :  { %646 = vadd.xlane.f32.xlu0 %v645_v37  ;;  %877 = vadd.xlane.f32.xlu1 %v876_v4 }
 0x1ad   :  { %v887_v8 = vsel %vm153_vm0, %v886_v51, 0.0 }
 0x1b0   :  { %767 = vadd.xlane.f32.xlu0 %v766_v40  ;;  %998 = vadd.xlane.f32.xlu1 %v997_v7 }
 0x1b4   :  { %888 = vadd.xlane.f32.xlu0 %v887_v8  ;;  %1009 = vadd.xlane.f32.xlu1 %v1008_v9 }
 0x1ca   :  { %308 = vrot.lane.b32.xlu0 %v306_v34, %s1288_s24 }
 0x225   :  { %v394_v14 = vpop.xlane.xlu1 %393 }
 0x226   :  { %v395_v16 = vsel %vm157_vm1, %v394_v14, 0.0 }
 0x227   :  { %v396_v2 = vrot.slane %v395_v16, 4 }
 0x229   :  { %v397_v6 = vadd.f32 %v396_v2, %v395_v16  ;;  %v515_v26 = vpop.xlane.xlu0 %514 }
 0x22a   :  { %v516_v27 = vsel %vm157_vm1, %v515_v26, 0.0 }
 0x22b   :  { %v398_v28 = vrot.slane %v397_v6, 2  ;;  %v517_v32 = vrot.slane %v516_v27, 4 }
 0x22d   :  { %v399_v33 = vadd.f32 %v398_v28, %v397_v6  ;;  %v518_v22 = vadd.f32 %v517_v32, %v516_v27  ;;  %v636_v23 = vpop.xlane.xlu1 %635  ;;  %v405_v25 = vpop.xlane.xlu0 %404 }
 0x22e   :  { %v637_v36 = vsel %vm157_vm1, %v636_v23, 0.0  ;;  %v406_v61 = vsel %vm157_vm1, %v405_v25, 0.0 }
 0x22f   :  { %v400_v41 = vrot.slane %v399_v33, 1  ;;  %v519_v42 = vrot.slane %v518_v22, 2  ;;  %v638_v43 = vrot.slane %v637_v36, 4  ;;  %v407_v20 = vrot.slane %v406_v61, 4 }
 0x231   :  { %v520_v17 = vadd.f32 %v519_v42, %v518_v22  ;;  %v639_v30 = vadd.f32 %v638_v43, %v637_v36  ;;  %v408_v44 = vadd.f32 %v407_v20, %v406_v61  ;;  %v757_v46 = vpop.xlane.xlu1 %756  ;;  %v526_v19 = vpop.xlane.xlu0 %525  ;;  %v401_v50 = vadd.f32 %v400_v41, %v399_v33 }
 0x232   :  { %v758_v1 = vsel %vm157_vm1, %v757_v46, 0.0  ;;  %v527_v49 = vsel %vm157_vm1, %v526_v19, 0.0 }
 0x233   :  { %v640_v52 = vrot.slane %v639_v30, 2  ;;  %v409_v29 = vrot.slane %v408_v44, 2  ;;  %v521_v31 = vrot.slane %v520_v17, 1  ;;  %v759_v54 = vrot.slane %v758_v1, 4 }
 0x234   :  { %v528_v55 = vrot.slane %v527_v49, 4  ;;  %v1689_v63 = vmul.f32 0.03125, %v401_v50 }
 0x235   :  { %v641_v39 = vadd.f32 %v640_v52, %v639_v30  ;;  %v410_v58 = vadd.f32 %v409_v29, %v408_v44  ;;  %v878_v53 = vpop.xlane.xlu1 %877  ;;  %v647_v59 = vpop.xlane.xlu0 %646  ;;  %v760_v60 = vadd.f32 %v759_v54, %v758_v1  ;;  %v522_v5 = vadd.f32 %v521_v31, %v520_v17 }
 0x236   :  { %v529_v62 = vadd.f32 %v528_v55, %v527_v49  ;;  %v879_v48 = vsel %vm157_vm1, %v878_v53, 0.0  ;;  %v648_v45 = vsel %vm157_vm1, %v647_v59, 0.0  ;;  %v415_v21 = vmul.f32 %v1689_v63, %v1689_v63 }
 0x237   :  { %v642_v3 = vrot.slane %v641_v39, 1  ;;  %v411_v37 = vrot.slane %v410_v58, 1  ;;  %v880_v4 = vrot.slane %v879_v48, 4  ;;  %v761_v40 = vrot.slane %v760_v60, 2 }
 0x238   :  { %v530_v7 = vrot.slane %v529_v62, 2  ;;  %v649_v51 = vrot.slane %v648_v45, 4  ;;  %v1694_v2 = vmul.f32 0.03125, %v522_v5 }
 0x239   :  { %v643_v57 = vadd.f32 %v642_v3, %v641_v39  ;;  %v412_v8 = vadd.f32 %v411_v37, %v410_v58  ;;  %v881_v9 = vadd.f32 %v880_v4, %v879_v48  ;;  %v999_v0 = vpop.xlane.xlu1 %998  ;;  %v768_v11 = vpop.xlane.xlu0 %767  ;;  %v762_v12 = vadd.f32 %v761_v40, %v760_v60 }
 0x23a   :  { %v531_v13 = vadd.f32 %v530_v7, %v529_v62  ;;  %v650_v10 = vadd.f32 %v649_v51, %v648_v45  ;;  %v1000_v15 = vsel %vm157_vm1, %v999_v0, 0.0  ;;  %v769_v27 = vsel %vm157_vm1, %v768_v11, 0.0 }
 0x23b   :  { %v414_v34 = vmul.f32 0.03125, %v412_v8  ;;  %v882_v14 = vrot.slane %v881_v9, 2  ;;  %v1001_v16 = vrot.slane %v1000_v15, 4  ;;  %v763_v32 = vrot.slane %v762_v12, 1 }
 0x23c   :  { %v532_v6 = vrot.slane %v531_v13, 1  ;;  %v651_v26 = vrot.slane %v650_v10, 2  ;;  %v1697_v25 = vmul.f32 0.03125, %v643_v57  ;;  %v770_v41 = vrot.slane %v769_v27, 4 }
 0x23d   :  { %v416_v28 = vsub.f32 %v414_v34, %v415_v21  ;;  %v1002_v33 = vadd.f32 %v1001_v16, %v1000_v15  ;;  %v1010_v22 = vpop.xlane.xlu1 %1009  ;;  %v889_v23 = vpop.xlane.xlu0 %888  ;;  %v883_v43 = vadd.f32 %v882_v14, %v881_v9  ;;  %v536_v30 = vmul.f32 %v1694_v2, %v1694_v2 }
 0x23e   :  { %v533_v36 = vadd.f32 %v532_v6, %v531_v13  ;;  %v652_v61 = vadd.f32 %v651_v26, %v650_v10  ;;  %v1011_v17 = vsel %vm157_vm1, %v1010_v22, 0.0  ;;  %v771_v19 = vadd.f32 %v770_v41, %v769_v27 }
 0x23f   :  { %v417_v42 = vadd.f32 1e-05, %v416_v28  ;;  %v1003_v20 = vrot.slane %v1002_v33, 2  ;;  %v764_v1 = vadd.f32 %v763_v32, %v762_v12  ;;  %v1012_v50 = vrot.slane %v1011_v17, 4 }
 0x240   :  { %v535_v44 = vmul.f32 0.03125, %v533_v36  ;;  %v653_v46 = vrot.slane %v652_v61, 1  ;;  %v657_v29 = vmul.f32 %v1697_v25, %v1697_v25  ;;  %v772_v55 = vrot.slane %v771_v19, 2 }
 0x241   :  { %1185 = vrsqrt.f32 %v417_v42  ;;  %v1004_v49 = vadd.f32 %v1003_v20, %v1002_v33  ;;  %v309_v52 = vpop.permute.xlu0 %308  ;;  %v884_v39 = vrot.slane %v883_v43, 1  ;;  %v1013_v53 = vadd.f32 %v1012_v50, %v1011_v17 }
 0x242   :  { %v537_v31 = vsub.f32 %v535_v44, %v536_v30  ;;  %v654_v54 = vadd.f32 %v653_v46, %v652_v61  ;;  %312 = vst.msk [vmem:[#allocation11] sm:$0x3] %vm311_vm2, %v309_v52  ;;  %v890_v59 = vsel %vm157_vm1, %v889_v23, 0.0  ;;  %v773_v48 = vadd.f32 %v772_v55, %v771_v19 }
 0x243   :  { %v1005_v58 = vrot.slane %v1004_v49, 1  ;;  %v891_v45 = vrot.slane %v890_v59, 4  ;;  %v1708_v3 = vmul.f32 0.03125, %v764_v1  ;;  %v1014_v4 = vrot.slane %v1013_v53, 2 }
 0x244   :  { %v538_v60 = vadd.f32 1e-05, %v537_v31  ;;  %v656_v62 = vmul.f32 0.03125, %v654_v54  ;;  %v774_v40 = vrot.slane %v773_v48, 1  ;;  %v885_v57 = vadd.f32 %v884_v39, %v883_v43 }
 0x245   :  { %v1006_v37 = vadd.f32 %v1005_v58, %v1004_v49  ;;  %v892_v7 = vadd.f32 %v891_v45, %v890_v59  ;;  %v1015_v51 = vadd.f32 %v1014_v4, %v1013_v53  ;;  %v778_v13 = vmul.f32 %v1708_v3, %v1708_v3 }
 0x246   :  { %1187 = vrsqrt.f32 %v538_v60  ;;  %v658_v5 = vsub.f32 %v656_v62, %v657_v29  ;;  %v775_v9 = vadd.f32 %v774_v40, %v773_v48  ;;  %v1718_v34 = vmul.f32 0.03125, %v885_v57 }
 0x247   :  { %v893_v0 = vrot.slane %v892_v7, 2  ;;  %v1712_v11 = vmul.f32 0.03125, %v1006_v37  ;;  %v1016_v12 = vrot.slane %v1015_v51, 1  ;;  %v420_v6 = vstv %s1706_s25 }
 0x248   :  { %v659_v8 = vadd.f32 1e-05, %v658_v5  ;;  %v777_v10 = vmul.f32 0.03125, %v775_v9  ;;  %v899_v36 = vmul.f32 %v1718_v34, %v1718_v34  ;;  %v424_v41 = vstv %s1710_s1 }
 0x249   :  { %v894_v15 = vadd.f32 %v893_v0, %v892_v7  ;;  %v1017_v21 = vadd.f32 %v1016_v12, %v1015_v51  ;;  %v1020_v26 = vmul.f32 %v1712_v11, %v1712_v11  ;;  %v541_v20 = vstv %s1714_s0 }
 0x24a   :  { %1189 = vrsqrt.f32 %v659_v8  ;;  %v779_v14 = vsub.f32 %v777_v10, %v778_v13  ;;  %v545_v50 = vstv %s1721_s26  ;;  %v662_v52 = vstv %s1725_s27 }
 0x24b   :  { %v895_v16 = vrot.slane %v894_v15, 1  ;;  %v1019_v27 = vmul.f32 0.03125, %v1017_v21  ;;  %v666_v39 = vstv %s1123_s13  ;;  %v783_v53 = vstv %s1136_s16 }
 0x24c   :  { %v780_v32 = vadd.f32 1e-05, %v779_v14  ;;  %v1025_v45 = vstv %s1164_s28  ;;  %v787_v37 = vstv %s1137_s29  ;;  %v1029_v51 = vstv %s1165_s5 }
 0x24d   :  { %v896_v33 = vadd.f32 %v895_v16, %v894_v15  ;;  %v1021_v22 = vsub.f32 %v1019_v27, %v1020_v26  ;;  %v908_v13 = vstv %s1151_s7 }
 0x24e   :  { %v1186_v28 = vpop.eup %1185  ;;  %1191 = vrsqrt.f32 %v780_v32 }
 0x24f   :  { %v421_v23 = vmul.f32 %v1186_v28, %v420_v6  ;;  %v898_v61 = vmul.f32 0.03125, %v896_v33  ;;  %v1022_v42 = vadd.f32 1e-05, %v1021_v22 }
 0x251   :  { %v423_v43 = vmul.f32 %v421_v23, %v1689_v63  ;;  %v900_v17 = vsub.f32 %v898_v61, %v899_v36  ;;  %1193 = vrsqrt.f32 %v1022_v42  ;;  %v426_v46 = vmul.f32 %v421_v23, %v1628_v38 }
 0x253   :  { %v1188_v30 = vpop.eup %1187  ;;  %v425_v44 = vsub.f32 %v424_v41, %v423_v43  ;;  %v901_v19 = vadd.f32 1e-05, %v900_v17 }
 0x254   :  { %v542_v1 = vmul.f32 %v1188_v30, %v541_v20 }
 0x255   :  { %v427_v49 = vadd.f32 %v426_v46, %v425_v44  ;;  %1195 = vrsqrt.f32 %v901_v19 }
 0x256   :  { %v544_v29 = vmul.f32 %v542_v1, %v1694_v2  ;;  %v547_v54 = vmul.f32 %v542_v1, %v1636_v18 }
 0x257   :  { %v1190_v31 = vpop.eup %1189  ;;  %429 = vrot.lane.b32.xlu0 %v427_v49, %s1284_s2  ;;  %s1290_s2 = smov 64  }
 0x258   :  { %v546_v63 = vsub.f32 %v545_v50, %v544_v29  ;;  %v663_v55 = vmul.f32 %v1190_v31, %v662_v52 }
 0x25a   :  { %v548_v38 = vadd.f32 %v547_v54, %v546_v63  ;;  %v665_v58 = vmul.f32 %v663_v55, %v1697_v25  ;;  %v668_v2 = vmul.f32 %v663_v55, %v1647_v47  ;;  %v904_v25 = vstv %s1150_s30 }
 0x25b   :  { %v1192_v60 = vpop.eup %1191 }
 0x25c   :  { %550 = vrot.lane.b32.xlu1 %v548_v38, %s1289_s6  ;;  %v667_v59 = vsub.f32 %v666_v39, %v665_v58  ;;  %v784_v48 = vmul.f32 %v1192_v60, %v783_v53 }
 0x25e   :  { %v669_v62 = vadd.f32 %v668_v2, %v667_v59  ;;  %v1194_v18 = vpop.eup %1193  ;;  %v786_v4 = vmul.f32 %v784_v48, %v1708_v3  ;;  %v789_v7 = vmul.f32 %v784_v48, %v1654_v56 }
 0x25f   :  { %v1026_v5 = vmul.f32 %v1194_v18, %v1025_v45 }
 0x260   :  { %671 = vrot.lane.b32.xlu1 %v669_v62, %s1290_s2  ;;  %v788_v40 = vsub.f32 %v787_v37, %v786_v4 }
 0x261   :  { %v1028_v47 = vmul.f32 %v1026_v5, %v1712_v11  ;;  %v1031_v12 = vmul.f32 %v1026_v5, %v1663_v35 }
 0x262   :  { %v1196_v57 = vpop.eup %1195  ;;  %v790_v8 = vadd.f32 %v789_v7, %v788_v40 }
 0x263   :  { %v905_v9 = vmul.f32 %v1196_v57, %v904_v25  ;;  %v1030_v0 = vsub.f32 %v1029_v51, %v1028_v47 }
 0x264   :  { %792 = vrot.lane.b32.xlu0 %v790_v8, %s1291_s8 }
 0x265   :  { %v907_v10 = vmul.f32 %v905_v9, %v1718_v34  ;;  %v1032_v3 = vadd.f32 %v1031_v12, %v1030_v0  ;;  %v910_v21 = vmul.f32 %v905_v9, %v1661_v24 }
 0x267   :  { %v909_v15 = vsub.f32 %v908_v13, %v907_v10 }
 0x268   :  { %1034 = vrot.lane.b32.xlu0 %v1032_v3, %s1292_s9 }
 0x269   :  { %v911_v56 = vadd.f32 %v910_v21, %v909_v15 }
 0x26b   :  { %913 = vrot.lane.b32.xlu1 %v911_v56, %s1293_s10 }
 0x2c9   :  { %v430_v11 = vpop.permute.xlu0 %429 }
 0x2ca   :  { %433 = vst.msk [vmem:[#allocation11] sm:$0x3] %vm432_vm3, %v430_v11 }
 0x2ce   :  { %v551_v14 = vpop.permute.xlu1 %550 }
 0x2cf   :  { %554 = vst.msk [vmem:[#allocation11] sm:$0x3] %vm553_vm4, %v551_v14 }
 0x2d2   :  { %v672_v35 = vpop.permute.xlu1 %671 }
 0x2d3   :  { %675 = vst.msk [vmem:[#allocation11] sm:$0x3] %vm674_vm5, %v672_v35 }
 0x2d6   :  { %v793_v34 = vpop.permute.xlu0 %792 }
 0x2d7   :  { %796 = vst.msk [vmem:[#allocation11] sm:$0x3] %vm795_vm6, %v793_v34 }
 0x2da   :  { %v1035_v24 = vpop.permute.xlu0 %1034 }
 0x2dd   :  { %v914_v16 = vpop.permute.xlu1 %913 }
 0x2de   :  { %917 = vst.msk [vmem:[#allocation11] sm:$0x3] %vm916_vm7, %v914_v16 }
 0x2df   :  { %1038 = vst.msk [vmem:[#allocation11] sm:$0x3] %vm1037_vm8, %v1035_v24 }
 0x2e0   :  { %1261 = shalt.err (!%p1258_p5)
}
 0x2e1   :  { %1048 = dma.vmem_to_hbm [thread:$0]  %s1046_s3, 32, %s1753_s4, [#allocation4]  }
 0x2e2   :  { %1278 = dma.done.wait [#allocation4], 32  }
 0x2e3   :  { %1279 = vsyncadd [#allocation4], 4294967264 }
 0x2e4   :  { %1052 = vsyncpa [#allocation3], 1 }
 0x2e5   :  { %1053 = vsyncpa [#allocation4], 1 }
 0x2e6   :  { %1054 = vsyncpa [#allocation5], 1 }
 0x2e7   :  { %1055 = vsyncpa [#allocation6], 1 }
 0x2e8   :  { %1056 = vsyncpa [#allocation9], 1 }

</bundles_post_ra>
